<compile_context>
chip_gen: v7x
topology: tpu7x:2x2x1
jax: 0.10.0
libtpu: 0.0.40
codegen_flags: <defaults>
</compile_context>

<pallas_src>
import math

import jax
import jax.numpy as jnp
from jax.experimental import pallas as pl
from jax.experimental.pallas import tpu as pltpu

# ----------------------------- model config ---------------------------------
B, S, H = 2, 8, 32          # batch, sequence, hidden
NH, HD = 2, 16              # heads, head dim
NLAYER = 2                  # transformer blocks
VOCAB = 64                  # (resized) vocab size
VOCAB_PAD = 128             # lane-dense padded vocab (LM head / logits)
NPOS = 16                   # max positions
NCLS = 4                    # classifier classes
NCLS_PAD = 128              # lane-dense padded classifier width
EOS2_ID = 50                # end_of_speaker_2_token_id
CLS_LOSS_WEIGHT = 0.5
LN_EPS = 1e-5
BS = B * S

VMEM_SPEC = pl.BlockSpec(memory_space=pltpu.MemorySpace.VMEM)


# ----------------------------- kernel helpers --------------------------------
def _layer_norm(x, g, b):
    mu = jnp.mean(x, axis=-1, keepdims=True)
    var = jnp.mean((x - mu) ** 2, axis=-1, keepdims=True)
    return (x - mu) * jax.lax.rsqrt(var + LN_EPS) * g + b


def _gelu_new(x):
    return 0.5 * x * (1.0 + jnp.tanh(
        math.sqrt(2.0 / math.pi) * (x + 0.044715 * x * x * x)))


def _sum_all(x):
    # (M, N) -> (1, 1) via two single-axis reductions (safe Mosaic lowering).
    return jnp.sum(jnp.sum(x, axis=1, keepdims=True), axis=0, keepdims=True)


def _bdot(a, b):
    # bf16 operands on the MXU, f32 accumulation.
    return jnp.dot(a.astype(jnp.bfloat16), b.astype(jnp.bfloat16),
                   preferred_element_type=jnp.float32)


def _qkt(q, k):
    # q @ k^T (contract last dims) without materializing a transpose.
    return jax.lax.dot_general(
        q.astype(jnp.bfloat16), k.astype(jnp.bfloat16),
        dimension_numbers=(((1,), (1,)), ((), ())),
        preferred_element_type=jnp.float32)


# ----------------------- fused whole-forward kernel ---------------------------
def fused_forward_kernel(
        x_ref,                                   # (BS, H) summed embeddings
        attn_bias_ref,                           # (BS, BS) block-causal additive mask
        ln1g_ref, ln1b_ref,                      # (NLAYER, 1, H)
        wattn_ref, battn_ref,                    # (NLAYER, H, 3H) bf16, (NLAYER, 1, 3H)
        wproj_ref, bproj_ref,                    # (NLAYER, H, H) bf16, (NLAYER, 1, H)
        ln2g_ref, ln2b_ref,                      # (NLAYER, 1, H)
        wfc_ref, bfc_ref,                        # (NLAYER, H, 4H) bf16, (NLAYER, 1, 4H)
        wout_ref, bout_ref,                      # (NLAYER, 4H, H) bf16, (NLAYER, 1, H)
        lnfg_ref, lnfb_ref,                      # (1, H)
        wte_t_ref,                               # (H, VOCAB_PAD) bf16 tied LM head
        vocab_bias_ref,                          # (1, VOCAB_PAD) additive pad mask
        lm_onehot_ref,                           # (BS, VOCAB_PAD) shifted-label one-hot
        cls_sel_ref,                             # (B, BS) CLS row-selection matrix
        wcls_ref, bcls_ref,                      # (H, NCLS_PAD) bf16, (1, NCLS_PAD)
        cls_bias_ref,                            # (1, NCLS_PAD) additive pad mask
        cls_onehot_ref,                          # (B, NCLS_PAD) class-label one-hot
        kv_ref,                                  # (BS, 2*NLAYER*H) lane-dense KV cache
        lm_logits_ref,                           # (BS, VOCAB_PAD)
        cls_logits_ref,                          # (B, NCLS_PAD)
        lm_loss_ref, cls_loss_ref):              # (1, 1) each
    attn_bias = attn_bias_ref[...]               # hoisted: shared by all layers/heads
    inv_sqrt_hd = jnp.float32(1.0 / math.sqrt(HD))

    x = x_ref[...]                               # (BS, H) residual stream
    kv_cols = []

    # Static layer loop is fine at NLAYER=2 (see TODO above for scaling).
    for l in range(NLAYER):
        # ---- attention block ----
        h2 = _layer_norm(x, ln1g_ref[l], ln1b_ref[l])
        qkv = _bdot(h2, wattn_ref[l]) + battn_ref[l]           # (BS, 3H) one fused matmul
        kv_cols.append(qkv[:, H:3 * H])                        # [K_l | V_l], one 64-wide slice

        o_heads = []
        for hh in range(NH):
            q_h = qkv[:, hh * HD:(hh + 1) * HD]                # (BS, HD)
            k_h = qkv[:, H + hh * HD:H + (hh + 1) * HD]
            v_h = qkv[:, 2 * H + hh * HD:2 * H + (hh + 1) * HD]
            s = _qkt(q_h, k_h) * inv_sqrt_hd + attn_bias       # (BS, BS), additive mask
            s = s - jnp.max(s, axis=-1, keepdims=True)
            p = jnp.exp(s)
            denom = jnp.sum(p, axis=-1, keepdims=True)
            o_h = _bdot(p, v_h)                                # unnormalized P@V
            o_heads.append(o_h * pl.reciprocal(denom, approx=True))
        attn = jnp.concatenate(o_heads, axis=-1)               # (BS, H)
        x = x + _bdot(attn, wproj_ref[l]) + bproj_ref[l]

        # ---- MLP block ----
        h2 = _layer_norm(x, ln2g_ref[l], ln2b_ref[l])
        m = _gelu_new(_bdot(h2, wfc_ref[l]) + bfc_ref[l])
        x = x + _bdot(m, wout_ref[l]) + bout_ref[l]

    # ---- single lane-dense KV-cache store: (BS, 2*NLAYER*H) = (16, 128) ----
    kv_ref[...] = jnp.concatenate(kv_cols, axis=-1)

    # ---- ln_f + tied LM head + shifted LM loss (vocab padded to 128 lanes) ----
    hn = _layer_norm(x, lnfg_ref[...], lnfb_ref[...])          # (BS, H)
    logits = _bdot(hn, wte_t_ref[...])                         # (BS, VOCAB_PAD)
    lm_logits_ref[...] = logits

    logits_m = logits + vocab_bias_ref[...]                    # mask padded lanes
    mx = jnp.max(logits_m, axis=-1, keepdims=True)
    lse = jnp.log(jnp.sum(jnp.exp(logits_m - mx), axis=-1, keepdims=True)) + mx
    onehot = lm_onehot_ref[...]
    valid = jnp.sum(onehot, axis=-1, keepdims=True)            # 1.0 / 0.0 per row
    lab_logit = jnp.sum(onehot * logits, axis=-1, keepdims=True)
    nll = (lse - lab_logit) * valid
    # NOTE: matches HF semantics (0/0 -> NaN if every shifted label is -100).
    lm_loss_ref[...] = _sum_all(nll) / _sum_all(valid)

    # ---- CLS vector select (selection matmul) + classifier + CLS loss ----
    cls_vecs = _bdot(cls_sel_ref[...], hn)                     # (B, H)
    cls_logits = _bdot(cls_vecs, wcls_ref[...]) + bcls_ref[...]  # (B, NCLS_PAD)
    cls_logits_ref[...] = cls_logits
    c_m = cls_logits + cls_bias_ref[...]
    mxc = jnp.max(c_m, axis=-1, keepdims=True)
    lsec = jnp.log(jnp.sum(jnp.exp(c_m - mxc), axis=-1, keepdims=True)) + mxc
    lab_c = jnp.sum(cls_onehot_ref[...] * cls_logits, axis=-1, keepdims=True)
    cls_loss_ref[...] = _sum_all(lsec - lab_c) / jnp.float32(B)


# ----------------------------- parameters ------------------------------------
def init_params(key):
    ks = iter(jax.random.split(key, 3 + 4 * NLAYER))

    def nrm(shape, std=0.02):
        return (std * jax.random.normal(next(ks), shape)).astype(jnp.float32)

    wte = nrm((VOCAB, H))
    wpe = nrm((NPOS, H))
    wcls = nrm((NCLS, H))       # torch nn.Linear weight layout (out, in)

    layers = {k: [] for k in ('ln1g', 'ln1b', 'wattn', 'battn', 'wproj',
                              'bproj', 'ln2g', 'ln2b', 'wfc', 'bfc',
                              'wout', 'bout')}
    for _ in range(NLAYER):
        layers['ln1g'].append(jnp.ones((1, H), jnp.float32))
        layers['ln1b'].append(jnp.zeros((1, H), jnp.float32))
        layers['wattn'].append(nrm((H, 3 * H)))          # HF Conv1D c_attn (in, out)
        layers['battn'].append(jnp.zeros((1, 3 * H), jnp.float32))
        layers['wproj'].append(nrm((H, H)))              # HF Conv1D c_proj
        layers['bproj'].append(jnp.zeros((1, H), jnp.float32))
        layers['ln2g'].append(jnp.ones((1, H), jnp.float32))
        layers['ln2b'].append(jnp.zeros((1, H), jnp.float32))
        layers['wfc'].append(nrm((H, 4 * H)))
        layers['bfc'].append(jnp.zeros((1, 4 * H), jnp.float32))
        layers['wout'].append(nrm((4 * H, H)))
        layers['bout'].append(jnp.zeros((1, H), jnp.float32))

    # Transposes / padding / bf16 casts hoisted to init (done once).
    wte_t_pad = jnp.zeros((H, VOCAB_PAD), jnp.float32).at[:, :VOCAB].set(wte.T)
    wcls_pad = jnp.zeros((H, NCLS_PAD), jnp.float32).at[:, :NCLS].set(wcls.T)

    params = {
        'wte': wte,
        'wpe': wpe,
        'lnfg': jnp.ones((1, H), jnp.float32),
        'lnfb': jnp.zeros((1, H), jnp.float32),
        'wte_t_pad': wte_t_pad.astype(jnp.bfloat16),
        'wcls_pad': wcls_pad.astype(jnp.bfloat16),
        'bcls_pad': jnp.zeros((1, NCLS_PAD), jnp.float32),
    }
    for k, v in layers.items():
        stacked = jnp.stack(v, axis=0)                    # (NLAYER, ...)
        if k in ('wattn', 'wproj', 'wfc', 'wout'):
            stacked = stacked.astype(jnp.bfloat16)        # MXU-native operands
        params[k] = stacked
    return params


# ----------------------------- forward (DialogModel) -------------------------
def dialog_forward(params, input_ids, token_type_ids, lm_labels, cls_labels):
    # Embedding gathers + index glue (one-hots, masks) stay in JAX/XLA.
    # TODO(synk): embedding / attention / residual dropout omitted (eval-mode).
    pos_ids = jnp.arange(S)
    x = (params['wte'][input_ids]
         + params['wpe'][pos_ids][None, :, :]
         + params['wte'][token_type_ids]).reshape(BS, H)

    # HF shifted LM labels: position t predicts token t+1; pad last with -100.
    labels_next = jnp.concatenate(
        [lm_labels[:, 1:], jnp.full((B, 1), -100, dtype=jnp.int32)],
        axis=1).reshape(BS)
    lm_onehot = ((labels_next[:, None] == jnp.arange(VOCAB_PAD)[None, :])
                 & (labels_next[:, None] >= 0)).astype(jnp.float32)

    # _extract_cls_token_vectors: fliplr -> == eos2 -> argmax.
    # Rows without EOS2 resolve to S-1, matching torch's fliplr/argmax behaviour.
    mask_flipped = (input_ids[:, ::-1] == EOS2_ID).astype(jnp.int32)
    cls_pos = (S - jnp.argmax(mask_flipped, axis=1) - 1).astype(jnp.int32)
    cls_sel = (jnp.arange(BS)[None, :]
               == (jnp.arange(B) * S + cls_pos)[:, None]).astype(jnp.float32)
    cls_onehot = (jnp.arange(NCLS_PAD)[None, :]
                  == cls_labels[:, None]).astype(jnp.float32)

    # Hoisted additive masks: block-causal over flattened (b, s) tokens and
    # lane-padding masks for vocab / classes.
    r = jnp.arange(BS)
    same_b = (r[:, None] // S) == (r[None, :] // S)
    causal = r[:, None] >= r[None, :]
    attn_bias = jnp.where(same_b & causal, 0.0, -1e9).astype(jnp.float32)
    vocab_bias = jnp.where(jnp.arange(VOCAB_PAD) < VOCAB, 0.0,
                           -1e30).astype(jnp.float32)[None, :]
    cls_bias = jnp.where(jnp.arange(NCLS_PAD) < NCLS, 0.0,
                         -1e30).astype(jnp.float32)[None, :]

    args = (x, attn_bias,
            params['ln1g'], params['ln1b'], params['wattn'], params['battn'],
            params['wproj'], params['bproj'], params['ln2g'], params['ln2b'],
            params['wfc'], params['bfc'], params['wout'], params['bout'],
            params['lnfg'], params['lnfb'],
            params['wte_t_pad'], vocab_bias, lm_onehot,
            cls_sel, params['wcls_pad'], params['bcls_pad'], cls_bias,
            cls_onehot)

    kv2d, lm_logits_pad, cls_logits_pad, lm_loss, cls_loss = pl.pallas_call(
        fused_forward_kernel,
        out_shape=(
            jax.ShapeDtypeStruct((BS, 2 * NLAYER * H), jnp.float32),  # lane-dense KV
            jax.ShapeDtypeStruct((BS, VOCAB_PAD), jnp.float32),
            jax.ShapeDtypeStruct((B, NCLS_PAD), jnp.float32),
            jax.ShapeDtypeStruct((1, 1), jnp.float32),
            jax.ShapeDtypeStruct((1, 1), jnp.float32),
        ),
        in_specs=[VMEM_SPEC] * len(args),
        out_specs=(VMEM_SPEC,) * 5,
    )(*args)

    lm_logits = lm_logits_pad.reshape(B, S, VOCAB_PAD)[:, :, :VOCAB]
    cls_logits = cls_logits_pad[:, :NCLS]
    lm_loss = lm_loss[0, 0]
    cls_loss = cls_loss[0, 0]
    loss = cls_loss * CLS_LOSS_WEIGHT + lm_loss

    # Lane-dense kernel KV layout -> HF (B, NH, S, HD) tuples (cheap XLA reshuffle).
    kv = kv2d.reshape(B, S, NLAYER, 2, NH, HD)
    past_key_values = tuple(
        (jnp.transpose(kv[:, :, l, 0], (0, 2, 1, 3)),
         jnp.transpose(kv[:, :, l, 1], (0, 2, 1, 3)))
        for l in range(NLAYER))

    return {'lm_loss': lm_loss, 'cls_loss': cls_loss, 'loss': loss,
            'lm_logits': lm_logits, 'cls_logits': cls_logits,
            'past_key_values': past_key_values}


# ----------------------------- main -------------------------------------------
if __name__ == "__main__":
    key = jax.random.PRNGKey(0)
    pkey, ikey, tkey, ckey = jax.random.split(key, 4)
    params = init_params(pkey)

    input_ids = jax.random.randint(ikey, (B, S), 0, VOCAB, dtype=jnp.int32)
    # Ensure each dialog contains end_of_speaker_2 tokens (CLS position source).
    input_ids = input_ids.at[0, 2].set(EOS2_ID).at[0, 5].set(EOS2_ID)
    input_ids = input_ids.at[1, 6].set(EOS2_ID)
    token_type_ids = jax.random.randint(tkey, (B, S), 0, 2, dtype=jnp.int32)
    lm_labels = input_ids.at[:, :2].set(-100)             # exercise ignore_index
    cls_labels = jax.random.randint(ckey, (B,), 0, NCLS, dtype=jnp.int32)

    out = jax.jit(dialog_forward)(params, input_ids, token_type_ids,
                                  lm_labels, cls_labels)
    jax.block_until_ready(out)

    assert out['lm_logits'].shape == (B, S, VOCAB)
    assert out['cls_logits'].shape == (B, NCLS)
    assert out['past_key_values'][0][0].shape == (B, NH, S, HD)
    assert bool(jnp.isfinite(out['loss']))
    print("KERNEL_OK")
</pallas_src>

<mosaic_0001>
module attributes {stable_mosaic.version = 11 : i64} {
  func.func @fused_forward_kernel(%arg0: memref<16x32xf32, #tpu.memory_space<vmem>>, %arg1: memref<16x16xf32, #tpu.memory_space<vmem>>, %arg2: memref<2x1x32xf32, #tpu.memory_space<vmem>>, %arg3: memref<2x1x32xf32, #tpu.memory_space<vmem>>, %arg4: memref<2x32x96xbf16, #tpu.memory_space<vmem>>, %arg5: memref<2x1x96xf32, #tpu.memory_space<vmem>>, %arg6: memref<2x32x32xbf16, #tpu.memory_space<vmem>>, %arg7: memref<2x1x32xf32, #tpu.memory_space<vmem>>, %arg8: memref<2x1x32xf32, #tpu.memory_space<vmem>>, %arg9: memref<2x1x32xf32, #tpu.memory_space<vmem>>, %arg10: memref<2x32x128xbf16, #tpu.memory_space<vmem>>, %arg11: memref<2x1x128xf32, #tpu.memory_space<vmem>>, %arg12: memref<2x128x32xbf16, #tpu.memory_space<vmem>>, %arg13: memref<2x1x32xf32, #tpu.memory_space<vmem>>, %arg14: memref<1x32xf32, #tpu.memory_space<vmem>>, %arg15: memref<1x32xf32, #tpu.memory_space<vmem>>, %arg16: memref<32x128xbf16, #tpu.memory_space<vmem>>, %arg17: memref<1x128xf32, #tpu.memory_space<vmem>>, %arg18: memref<16x128xf32, #tpu.memory_space<vmem>>, %arg19: memref<2x16xf32, #tpu.memory_space<vmem>>, %arg20: memref<32x128xbf16, #tpu.memory_space<vmem>>, %arg21: memref<1x128xf32, #tpu.memory_space<vmem>>, %arg22: memref<1x128xf32, #tpu.memory_space<vmem>>, %arg23: memref<2x128xf32, #tpu.memory_space<vmem>>, %arg24: memref<16x128xf32, #tpu.memory_space<vmem>>, %arg25: memref<16x128xf32, #tpu.memory_space<vmem>>, %arg26: memref<2x128xf32, #tpu.memory_space<vmem>>, %arg27: memref<1x1xf32, #tpu.memory_space<vmem>>, %arg28: memref<1x1xf32, #tpu.memory_space<vmem>>) attributes {dimension_semantics = [], scalar_prefetch = 0 : i64, scratch_operands = 0 : i64, tpu.core_type = #tpu.core_type<tc>} {
    %c0 = arith.constant 0 : index
    %c0_0 = arith.constant 0 : index
    %0 = vector.load %arg1[%c0, %c0_0] : memref<16x16xf32, #tpu.memory_space<vmem>>, vector<16x16xf32>
    %c0_1 = arith.constant 0 : index
    %c0_2 = arith.constant 0 : index
    %1 = vector.load %arg0[%c0_1, %c0_2] : memref<16x32xf32, #tpu.memory_space<vmem>>, vector<16x32xf32>
    %c0_3 = arith.constant 0 : index
    %c0_4 = arith.constant 0 : index
    %c0_5 = arith.constant 0 : index
    %2 = vector.load %arg2[%c0_3, %c0_4, %c0_5] : memref<2x1x32xf32, #tpu.memory_space<vmem>>, vector<1x1x32xf32>
    %3 = vector.shape_cast %2 : vector<1x1x32xf32> to vector<1x32xf32>
    %c0_6 = arith.constant 0 : index
    %c0_7 = arith.constant 0 : index
    %c0_8 = arith.constant 0 : index
    %4 = vector.load %arg3[%c0_6, %c0_7, %c0_8] : memref<2x1x32xf32, #tpu.memory_space<vmem>>, vector<1x1x32xf32>
    %5 = vector.shape_cast %4 : vector<1x1x32xf32> to vector<1x32xf32>
    %cst = arith.constant dense<0.000000e+00> : vector<16xf32>
    %6 = vector.multi_reduction <add>, %1, %cst [1] : vector<16x32xf32> to vector<16xf32>
    %7 = vector.shape_cast %6 : vector<16xf32> to vector<16x1xf32>
    %cst_9 = arith.constant 3.200000e+01 : f32
    %8 = vector.broadcast %cst_9 : f32 to vector<16x1xf32>
    %9 = arith.divf %7, %8 : vector<16x1xf32>
    %10 = vector.broadcast %9 : vector<16x1xf32> to vector<16x32xf32>
    %11 = arith.subf %1, %10 : vector<16x32xf32>
    %12 = arith.mulf %11, %11 : vector<16x32xf32>
    %cst_10 = arith.constant dense<0.000000e+00> : vector<16xf32>
    %13 = vector.multi_reduction <add>, %12, %cst_10 [1] : vector<16x32xf32> to vector<16xf32>
    %14 = vector.shape_cast %13 : vector<16xf32> to vector<16x1xf32>
    %cst_11 = arith.constant 3.200000e+01 : f32
    %15 = vector.broadcast %cst_11 : f32 to vector<16x1xf32>
    %16 = arith.divf %14, %15 : vector<16x1xf32>
    %17 = vector.broadcast %9 : vector<16x1xf32> to vector<16x32xf32>
    %18 = arith.subf %1, %17 : vector<16x32xf32>
    %cst_12 = arith.constant 9.99999974E-6 : f32
    %19 = vector.broadcast %cst_12 : f32 to vector<16x1xf32>
    %20 = arith.addf %16, %19 : vector<16x1xf32>
    %21 = math.rsqrt %20 : vector<16x1xf32>
    %22 = vector.broadcast %21 : vector<16x1xf32> to vector<16x32xf32>
    %23 = arith.mulf %18, %22 : vector<16x32xf32>
    %24 = vector.broadcast %3 : vector<1x32xf32> to vector<16x32xf32>
    %25 = arith.mulf %23, %24 : vector<16x32xf32>
    %26 = vector.broadcast %5 : vector<1x32xf32> to vector<16x32xf32>
    %27 = arith.addf %25, %26 : vector<16x32xf32>
    %c0_13 = arith.constant 0 : index
    %c0_14 = arith.constant 0 : index
    %c0_15 = arith.constant 0 : index
    %28 = vector.load %arg4[%c0_13, %c0_14, %c0_15] : memref<2x32x96xbf16, #tpu.memory_space<vmem>>, vector<1x32x96xbf16>
    %29 = vector.shape_cast %28 : vector<1x32x96xbf16> to vector<32x96xbf16>
    %30 = arith.truncf %27 : vector<16x32xf32> to vector<16x32xbf16>
    %cst_16 = arith.constant dense<0.000000e+00> : vector<16x96xf32>
    %31 = tpu.matmul %30, %29, %cst_16 {dimension_numbers = #tpu.dot_dimension_numbers<[1], [0], [0], [1], [0, 0, 1, 1], [], []>} : vector<16x32xbf16>, vector<32x96xbf16>, vector<16x96xf32> -> vector<16x96xf32>
    %c0_17 = arith.constant 0 : index
    %c0_18 = arith.constant 0 : index
    %c0_19 = arith.constant 0 : index
    %32 = vector.load %arg5[%c0_17, %c0_18, %c0_19] : memref<2x1x96xf32, #tpu.memory_space<vmem>>, vector<1x1x96xf32>
    %33 = vector.shape_cast %32 : vector<1x1x96xf32> to vector<1x96xf32>
    %34 = vector.broadcast %33 : vector<1x96xf32> to vector<16x96xf32>
    %35 = arith.addf %31, %34 : vector<16x96xf32>
    %36 = vector.extract_strided_slice %35 {offsets = [0, 32], sizes = [16, 64], strides = [1, 1]} : vector<16x96xf32> to vector<16x64xf32>
    %37 = vector.extract_strided_slice %35 {offsets = [0, 0], sizes = [16, 16], strides = [1, 1]} : vector<16x96xf32> to vector<16x16xf32>
    %38 = vector.extract_strided_slice %35 {offsets = [0, 32], sizes = [16, 16], strides = [1, 1]} : vector<16x96xf32> to vector<16x16xf32>
    %39 = vector.extract_strided_slice %35 {offsets = [0, 64], sizes = [16, 16], strides = [1, 1]} : vector<16x96xf32> to vector<16x16xf32>
    %40 = arith.truncf %37 : vector<16x16xf32> to vector<16x16xbf16>
    %41 = arith.truncf %38 : vector<16x16xf32> to vector<16x16xbf16>
    %cst_20 = arith.constant dense<0.000000e+00> : vector<16x16xf32>
    %42 = tpu.matmul %40, %41, %cst_20 {dimension_numbers = #tpu.dot_dimension_numbers<[1], [1], [0], [0], [0, 0, 1, 0], [], []>} : vector<16x16xbf16>, vector<16x16xbf16>, vector<16x16xf32> -> vector<16x16xf32>
    %cst_21 = arith.constant 2.500000e-01 : f32
    %43 = vector.broadcast %cst_21 : f32 to vector<16x16xf32>
    %44 = arith.mulf %42, %43 : vector<16x16xf32>
    %45 = arith.addf %44, %0 : vector<16x16xf32>
    %cst_22 = arith.constant dense<0xFF800000> : vector<16xf32>
    %46 = vector.multi_reduction <maximumf>, %45, %cst_22 [1] : vector<16x16xf32> to vector<16xf32>
    %47 = vector.shape_cast %46 : vector<16xf32> to vector<16x1xf32>
    %48 = vector.broadcast %47 : vector<16x1xf32> to vector<16x16xf32>
    %49 = arith.subf %45, %48 : vector<16x16xf32>
    %50 = math.exp %49 : vector<16x16xf32>
    %cst_23 = arith.constant dense<0.000000e+00> : vector<16xf32>
    %51 = vector.multi_reduction <add>, %50, %cst_23 [1] : vector<16x16xf32> to vector<16xf32>
    %52 = vector.shape_cast %51 : vector<16xf32> to vector<16x1xf32>
    %53 = arith.truncf %50 : vector<16x16xf32> to vector<16x16xbf16>
    %54 = arith.truncf %39 : vector<16x16xf32> to vector<16x16xbf16>
    %cst_24 = arith.constant dense<0.000000e+00> : vector<16x16xf32>
    %55 = tpu.matmul %53, %54, %cst_24 {dimension_numbers = #tpu.dot_dimension_numbers<[1], [0], [0], [1], [0, 0, 1, 1], [], []>} : vector<16x16xbf16>, vector<16x16xbf16>, vector<16x16xf32> -> vector<16x16xf32>
    %56 = tpu.reciprocal %52 {approx = true} : vector<16x1xf32> -> vector<16x1xf32>
    %57 = vector.broadcast %56 : vector<16x1xf32> to vector<16x16xf32>
    %58 = arith.mulf %55, %57 : vector<16x16xf32>
    %59 = vector.extract_strided_slice %35 {offsets = [0, 16], sizes = [16, 16], strides = [1, 1]} : vector<16x96xf32> to vector<16x16xf32>
    %60 = vector.extract_strided_slice %35 {offsets = [0, 48], sizes = [16, 16], strides = [1, 1]} : vector<16x96xf32> to vector<16x16xf32>
    %61 = vector.extract_strided_slice %35 {offsets = [0, 80], sizes = [16, 16], strides = [1, 1]} : vector<16x96xf32> to vector<16x16xf32>
    %62 = arith.truncf %59 : vector<16x16xf32> to vector<16x16xbf16>
    %63 = arith.truncf %60 : vector<16x16xf32> to vector<16x16xbf16>
    %cst_25 = arith.constant dense<0.000000e+00> : vector<16x16xf32>
    %64 = tpu.matmul %62, %63, %cst_25 {dimension_numbers = #tpu.dot_dimension_numbers<[1], [1], [0], [0], [0, 0, 1, 0], [], []>} : vector<16x16xbf16>, vector<16x16xbf16>, vector<16x16xf32> -> vector<16x16xf32>
    %cst_26 = arith.constant 2.500000e-01 : f32
    %65 = vector.broadcast %cst_26 : f32 to vector<16x16xf32>
    %66 = arith.mulf %64, %65 : vector<16x16xf32>
    %67 = arith.addf %66, %0 : vector<16x16xf32>
    %cst_27 = arith.constant dense<0xFF800000> : vector<16xf32>
    %68 = vector.multi_reduction <maximumf>, %67, %cst_27 [1] : vector<16x16xf32> to vector<16xf32>
    %69 = vector.shape_cast %68 : vector<16xf32> to vector<16x1xf32>
    %70 = vector.broadcast %69 : vector<16x1xf32> to vector<16x16xf32>
    %71 = arith.subf %67, %70 : vector<16x16xf32>
    %72 = math.exp %71 : vector<16x16xf32>
    %cst_28 = arith.constant dense<0.000000e+00> : vector<16xf32>
    %73 = vector.multi_reduction <add>, %72, %cst_28 [1] : vector<16x16xf32> to vector<16xf32>
    %74 = vector.shape_cast %73 : vector<16xf32> to vector<16x1xf32>
    %75 = arith.truncf %72 : vector<16x16xf32> to vector<16x16xbf16>
    %76 = arith.truncf %61 : vector<16x16xf32> to vector<16x16xbf16>
    %cst_29 = arith.constant dense<0.000000e+00> : vector<16x16xf32>
    %77 = tpu.matmul %75, %76, %cst_29 {dimension_numbers = #tpu.dot_dimension_numbers<[1], [0], [0], [1], [0, 0, 1, 1], [], []>} : vector<16x16xbf16>, vector<16x16xbf16>, vector<16x16xf32> -> vector<16x16xf32>
    %78 = tpu.reciprocal %74 {approx = true} : vector<16x1xf32> -> vector<16x1xf32>
    %79 = vector.broadcast %78 : vector<16x1xf32> to vector<16x16xf32>
    %80 = arith.mulf %77, %79 : vector<16x16xf32>
    %81 = tpu.concatenate %58, %80 in 1 : vector<16x16xf32>, vector<16x16xf32> -> vector<16x32xf32>
    %c0_30 = arith.constant 0 : index
    %c0_31 = arith.constant 0 : index
    %c0_32 = arith.constant 0 : index
    %82 = vector.load %arg6[%c0_30, %c0_31, %c0_32] : memref<2x32x32xbf16, #tpu.memory_space<vmem>>, vector<1x32x32xbf16>
    %83 = vector.shape_cast %82 : vector<1x32x32xbf16> to vector<32x32xbf16>
    %84 = arith.truncf %81 : vector<16x32xf32> to vector<16x32xbf16>
    %cst_33 = arith.constant dense<0.000000e+00> : vector<16x32xf32>
    %85 = tpu.matmul %84, %83, %cst_33 {dimension_numbers = #tpu.dot_dimension_numbers<[1], [0], [0], [1], [0, 0, 1, 1], [], []>} : vector<16x32xbf16>, vector<32x32xbf16>, vector<16x32xf32> -> vector<16x32xf32>
    %86 = arith.addf %1, %85 : vector<16x32xf32>
    %c0_34 = arith.constant 0 : index
    %c0_35 = arith.constant 0 : index
    %c0_36 = arith.constant 0 : index
    %87 = vector.load %arg7[%c0_34, %c0_35, %c0_36] : memref<2x1x32xf32, #tpu.memory_space<vmem>>, vector<1x1x32xf32>
    %88 = vector.shape_cast %87 : vector<1x1x32xf32> to vector<1x32xf32>
    %89 = vector.broadcast %88 : vector<1x32xf32> to vector<16x32xf32>
    %90 = arith.addf %86, %89 : vector<16x32xf32>
    %c0_37 = arith.constant 0 : index
    %c0_38 = arith.constant 0 : index
    %c0_39 = arith.constant 0 : index
    %91 = vector.load %arg8[%c0_37, %c0_38, %c0_39] : memref<2x1x32xf32, #tpu.memory_space<vmem>>, vector<1x1x32xf32>
    %92 = vector.shape_cast %91 : vector<1x1x32xf32> to vector<1x32xf32>
    %c0_40 = arith.constant 0 : index
    %c0_41 = arith.constant 0 : index
    %c0_42 = arith.constant 0 : index
    %93 = vector.load %arg9[%c0_40, %c0_41, %c0_42] : memref<2x1x32xf32, #tpu.memory_space<vmem>>, vector<1x1x32xf32>
    %94 = vector.shape_cast %93 : vector<1x1x32xf32> to vector<1x32xf32>
    %cst_43 = arith.constant dense<0.000000e+00> : vector<16xf32>
    %95 = vector.multi_reduction <add>, %90, %cst_43 [1] : vector<16x32xf32> to vector<16xf32>
    %96 = vector.shape_cast %95 : vector<16xf32> to vector<16x1xf32>
    %cst_44 = arith.constant 3.200000e+01 : f32
    %97 = vector.broadcast %cst_44 : f32 to vector<16x1xf32>
    %98 = arith.divf %96, %97 : vector<16x1xf32>
    %99 = vector.broadcast %98 : vector<16x1xf32> to vector<16x32xf32>
    %100 = arith.subf %90, %99 : vector<16x32xf32>
    %101 = arith.mulf %100, %100 : vector<16x32xf32>
    %cst_45 = arith.constant dense<0.000000e+00> : vector<16xf32>
    %102 = vector.multi_reduction <add>, %101, %cst_45 [1] : vector<16x32xf32> to vector<16xf32>
    %103 = vector.shape_cast %102 : vector<16xf32> to vector<16x1xf32>
    %cst_46 = arith.constant 3.200000e+01 : f32
    %104 = vector.broadcast %cst_46 : f32 to vector<16x1xf32>
    %105 = arith.divf %103, %104 : vector<16x1xf32>
    %106 = vector.broadcast %98 : vector<16x1xf32> to vector<16x32xf32>
    %107 = arith.subf %90, %106 : vector<16x32xf32>
    %cst_47 = arith.constant 9.99999974E-6 : f32
    %108 = vector.broadcast %cst_47 : f32 to vector<16x1xf32>
    %109 = arith.addf %105, %108 : vector<16x1xf32>
    %110 = math.rsqrt %109 : vector<16x1xf32>
    %111 = vector.broadcast %110 : vector<16x1xf32> to vector<16x32xf32>
    %112 = arith.mulf %107, %111 : vector<16x32xf32>
    %113 = vector.broadcast %92 : vector<1x32xf32> to vector<16x32xf32>
    %114 = arith.mulf %112, %113 : vector<16x32xf32>
    %115 = vector.broadcast %94 : vector<1x32xf32> to vector<16x32xf32>
    %116 = arith.addf %114, %115 : vector<16x32xf32>
    %c0_48 = arith.constant 0 : index
    %c0_49 = arith.constant 0 : index
    %c0_50 = arith.constant 0 : index
    %117 = vector.load %arg10[%c0_48, %c0_49, %c0_50] : memref<2x32x128xbf16, #tpu.memory_space<vmem>>, vector<1x32x128xbf16>
    %118 = vector.shape_cast %117 : vector<1x32x128xbf16> to vector<32x128xbf16>
    %119 = arith.truncf %116 : vector<16x32xf32> to vector<16x32xbf16>
    %cst_51 = arith.constant dense<0.000000e+00> : vector<16x128xf32>
    %120 = tpu.matmul %119, %118, %cst_51 {dimension_numbers = #tpu.dot_dimension_numbers<[1], [0], [0], [1], [0, 0, 1, 1], [], []>} : vector<16x32xbf16>, vector<32x128xbf16>, vector<16x128xf32> -> vector<16x128xf32>
    %c0_52 = arith.constant 0 : index
    %c0_53 = arith.constant 0 : index
    %c0_54 = arith.constant 0 : index
    %121 = vector.load %arg11[%c0_52, %c0_53, %c0_54] : memref<2x1x128xf32, #tpu.memory_space<vmem>>, vector<1x1x128xf32>
    %122 = vector.shape_cast %121 : vector<1x1x128xf32> to vector<1x128xf32>
    %123 = vector.broadcast %122 : vector<1x128xf32> to vector<16x128xf32>
    %124 = arith.addf %120, %123 : vector<16x128xf32>
    %cst_55 = arith.constant 5.000000e-01 : f32
    %125 = vector.broadcast %cst_55 : f32 to vector<16x128xf32>
    %126 = arith.mulf %125, %124 : vector<16x128xf32>
    %cst_56 = arith.constant 4.471500e-02 : f32
    %127 = vector.broadcast %cst_56 : f32 to vector<16x128xf32>
    %128 = arith.mulf %127, %124 : vector<16x128xf32>
    %129 = arith.mulf %128, %124 : vector<16x128xf32>
    %130 = arith.mulf %129, %124 : vector<16x128xf32>
    %131 = arith.addf %124, %130 : vector<16x128xf32>
    %cst_57 = arith.constant 0.797884583 : f32
    %132 = vector.broadcast %cst_57 : f32 to vector<16x128xf32>
    %133 = arith.mulf %132, %131 : vector<16x128xf32>
    %134 = math.tanh %133 : vector<16x128xf32>
    %cst_58 = arith.constant 1.000000e+00 : f32
    %135 = vector.broadcast %cst_58 : f32 to vector<16x128xf32>
    %136 = arith.addf %135, %134 : vector<16x128xf32>
    %137 = arith.mulf %126, %136 : vector<16x128xf32>
    %c0_59 = arith.constant 0 : index
    %c0_60 = arith.constant 0 : index
    %c0_61 = arith.constant 0 : index
    %138 = vector.load %arg12[%c0_59, %c0_60, %c0_61] : memref<2x128x32xbf16, #tpu.memory_space<vmem>>, vector<1x128x32xbf16>
    %139 = vector.shape_cast %138 : vector<1x128x32xbf16> to vector<128x32xbf16>
    %140 = arith.truncf %137 : vector<16x128xf32> to vector<16x128xbf16>
    %cst_62 = arith.constant dense<0.000000e+00> : vector<16x32xf32>
    %141 = tpu.matmul %140, %139, %cst_62 {dimension_numbers = #tpu.dot_dimension_numbers<[1], [0], [0], [1], [0, 0, 1, 1], [], []>} : vector<16x128xbf16>, vector<128x32xbf16>, vector<16x32xf32> -> vector<16x32xf32>
    %142 = arith.addf %90, %141 : vector<16x32xf32>
    %c0_63 = arith.constant 0 : index
    %c0_64 = arith.constant 0 : index
    %c0_65 = arith.constant 0 : index
    %143 = vector.load %arg13[%c0_63, %c0_64, %c0_65] : memref<2x1x32xf32, #tpu.memory_space<vmem>>, vector<1x1x32xf32>
    %144 = vector.shape_cast %143 : vector<1x1x32xf32> to vector<1x32xf32>
    %145 = vector.broadcast %144 : vector<1x32xf32> to vector<16x32xf32>
    %146 = arith.addf %142, %145 : vector<16x32xf32>
    %c1 = arith.constant 1 : index
    %c0_66 = arith.constant 0 : index
    %c0_67 = arith.constant 0 : index
    %147 = vector.load %arg2[%c1, %c0_66, %c0_67] : memref<2x1x32xf32, #tpu.memory_space<vmem>>, vector<1x1x32xf32>
    %148 = vector.shape_cast %147 : vector<1x1x32xf32> to vector<1x32xf32>
    %c1_68 = arith.constant 1 : index
    %c0_69 = arith.constant 0 : index
    %c0_70 = arith.constant 0 : index
    %149 = vector.load %arg3[%c1_68, %c0_69, %c0_70] : memref<2x1x32xf32, #tpu.memory_space<vmem>>, vector<1x1x32xf32>
    %150 = vector.shape_cast %149 : vector<1x1x32xf32> to vector<1x32xf32>
    %cst_71 = arith.constant dense<0.000000e+00> : vector<16xf32>
    %151 = vector.multi_reduction <add>, %146, %cst_71 [1] : vector<16x32xf32> to vector<16xf32>
    %152 = vector.shape_cast %151 : vector<16xf32> to vector<16x1xf32>
    %cst_72 = arith.constant 3.200000e+01 : f32
    %153 = vector.broadcast %cst_72 : f32 to vector<16x1xf32>
    %154 = arith.divf %152, %153 : vector<16x1xf32>
    %155 = vector.broadcast %154 : vector<16x1xf32> to vector<16x32xf32>
    %156 = arith.subf %146, %155 : vector<16x32xf32>
    %157 = arith.mulf %156, %156 : vector<16x32xf32>
    %cst_73 = arith.constant dense<0.000000e+00> : vector<16xf32>
    %158 = vector.multi_reduction <add>, %157, %cst_73 [1] : vector<16x32xf32> to vector<16xf32>
    %159 = vector.shape_cast %158 : vector<16xf32> to vector<16x1xf32>
    %cst_74 = arith.constant 3.200000e+01 : f32
    %160 = vector.broadcast %cst_74 : f32 to vector<16x1xf32>
    %161 = arith.divf %159, %160 : vector<16x1xf32>
    %162 = vector.broadcast %154 : vector<16x1xf32> to vector<16x32xf32>
    %163 = arith.subf %146, %162 : vector<16x32xf32>
    %cst_75 = arith.constant 9.99999974E-6 : f32
    %164 = vector.broadcast %cst_75 : f32 to vector<16x1xf32>
    %165 = arith.addf %161, %164 : vector<16x1xf32>
    %166 = math.rsqrt %165 : vector<16x1xf32>
    %167 = vector.broadcast %166 : vector<16x1xf32> to vector<16x32xf32>
    %168 = arith.mulf %163, %167 : vector<16x32xf32>
    %169 = vector.broadcast %148 : vector<1x32xf32> to vector<16x32xf32>
    %170 = arith.mulf %168, %169 : vector<16x32xf32>
    %171 = vector.broadcast %150 : vector<1x32xf32> to vector<16x32xf32>
    %172 = arith.addf %170, %171 : vector<16x32xf32>
    %c1_76 = arith.constant 1 : index
    %c0_77 = arith.constant 0 : index
    %c0_78 = arith.constant 0 : index
    %173 = vector.load %arg4[%c1_76, %c0_77, %c0_78] : memref<2x32x96xbf16, #tpu.memory_space<vmem>>, vector<1x32x96xbf16>
    %174 = vector.shape_cast %173 : vector<1x32x96xbf16> to vector<32x96xbf16>
    %175 = arith.truncf %172 : vector<16x32xf32> to vector<16x32xbf16>
    %cst_79 = arith.constant dense<0.000000e+00> : vector<16x96xf32>
    %176 = tpu.matmul %175, %174, %cst_79 {dimension_numbers = #tpu.dot_dimension_numbers<[1], [0], [0], [1], [0, 0, 1, 1], [], []>} : vector<16x32xbf16>, vector<32x96xbf16>, vector<16x96xf32> -> vector<16x96xf32>
    %c1_80 = arith.constant 1 : index
    %c0_81 = arith.constant 0 : index
    %c0_82 = arith.constant 0 : index
    %177 = vector.load %arg5[%c1_80, %c0_81, %c0_82] : memref<2x1x96xf32, #tpu.memory_space<vmem>>, vector<1x1x96xf32>
    %178 = vector.shape_cast %177 : vector<1x1x96xf32> to vector<1x96xf32>
    %179 = vector.broadcast %178 : vector<1x96xf32> to vector<16x96xf32>
    %180 = arith.addf %176, %179 : vector<16x96xf32>
    %181 = vector.extract_strided_slice %180 {offsets = [0, 32], sizes = [16, 64], strides = [1, 1]} : vector<16x96xf32> to vector<16x64xf32>
    %182 = vector.extract_strided_slice %180 {offsets = [0, 0], sizes = [16, 16], strides = [1, 1]} : vector<16x96xf32> to vector<16x16xf32>
    %183 = vector.extract_strided_slice %180 {offsets = [0, 32], sizes = [16, 16], strides = [1, 1]} : vector<16x96xf32> to vector<16x16xf32>
    %184 = vector.extract_strided_slice %180 {offsets = [0, 64], sizes = [16, 16], strides = [1, 1]} : vector<16x96xf32> to vector<16x16xf32>
    %185 = arith.truncf %182 : vector<16x16xf32> to vector<16x16xbf16>
    %186 = arith.truncf %183 : vector<16x16xf32> to vector<16x16xbf16>
    %cst_83 = arith.constant dense<0.000000e+00> : vector<16x16xf32>
    %187 = tpu.matmul %185, %186, %cst_83 {dimension_numbers = #tpu.dot_dimension_numbers<[1], [1], [0], [0], [0, 0, 1, 0], [], []>} : vector<16x16xbf16>, vector<16x16xbf16>, vector<16x16xf32> -> vector<16x16xf32>
    %cst_84 = arith.constant 2.500000e-01 : f32
    %188 = vector.broadcast %cst_84 : f32 to vector<16x16xf32>
    %189 = arith.mulf %187, %188 : vector<16x16xf32>
    %190 = arith.addf %189, %0 : vector<16x16xf32>
    %cst_85 = arith.constant dense<0xFF800000> : vector<16xf32>
    %191 = vector.multi_reduction <maximumf>, %190, %cst_85 [1] : vector<16x16xf32> to vector<16xf32>
    %192 = vector.shape_cast %191 : vector<16xf32> to vector<16x1xf32>
    %193 = vector.broadcast %192 : vector<16x1xf32> to vector<16x16xf32>
    %194 = arith.subf %190, %193 : vector<16x16xf32>
    %195 = math.exp %194 : vector<16x16xf32>
    %cst_86 = arith.constant dense<0.000000e+00> : vector<16xf32>
    %196 = vector.multi_reduction <add>, %195, %cst_86 [1] : vector<16x16xf32> to vector<16xf32>
    %197 = vector.shape_cast %196 : vector<16xf32> to vector<16x1xf32>
    %198 = arith.truncf %195 : vector<16x16xf32> to vector<16x16xbf16>
    %199 = arith.truncf %184 : vector<16x16xf32> to vector<16x16xbf16>
    %cst_87 = arith.constant dense<0.000000e+00> : vector<16x16xf32>
    %200 = tpu.matmul %198, %199, %cst_87 {dimension_numbers = #tpu.dot_dimension_numbers<[1], [0], [0], [1], [0, 0, 1, 1], [], []>} : vector<16x16xbf16>, vector<16x16xbf16>, vector<16x16xf32> -> vector<16x16xf32>
    %201 = tpu.reciprocal %197 {approx = true} : vector<16x1xf32> -> vector<16x1xf32>
    %202 = vector.broadcast %201 : vector<16x1xf32> to vector<16x16xf32>
    %203 = arith.mulf %200, %202 : vector<16x16xf32>
    %204 = vector.extract_strided_slice %180 {offsets = [0, 16], sizes = [16, 16], strides = [1, 1]} : vector<16x96xf32> to vector<16x16xf32>
    %205 = vector.extract_strided_slice %180 {offsets = [0, 48], sizes = [16, 16], strides = [1, 1]} : vector<16x96xf32> to vector<16x16xf32>
    %206 = vector.extract_strided_slice %180 {offsets = [0, 80], sizes = [16, 16], strides = [1, 1]} : vector<16x96xf32> to vector<16x16xf32>
    %207 = arith.truncf %204 : vector<16x16xf32> to vector<16x16xbf16>
    %208 = arith.truncf %205 : vector<16x16xf32> to vector<16x16xbf16>
    %cst_88 = arith.constant dense<0.000000e+00> : vector<16x16xf32>
    %209 = tpu.matmul %207, %208, %cst_88 {dimension_numbers = #tpu.dot_dimension_numbers<[1], [1], [0], [0], [0, 0, 1, 0], [], []>} : vector<16x16xbf16>, vector<16x16xbf16>, vector<16x16xf32> -> vector<16x16xf32>
    %cst_89 = arith.constant 2.500000e-01 : f32
    %210 = vector.broadcast %cst_89 : f32 to vector<16x16xf32>
    %211 = arith.mulf %209, %210 : vector<16x16xf32>
    %212 = arith.addf %211, %0 : vector<16x16xf32>
    %cst_90 = arith.constant dense<0xFF800000> : vector<16xf32>
    %213 = vector.multi_reduction <maximumf>, %212, %cst_90 [1] : vector<16x16xf32> to vector<16xf32>
    %214 = vector.shape_cast %213 : vector<16xf32> to vector<16x1xf32>
    %215 = vector.broadcast %214 : vector<16x1xf32> to vector<16x16xf32>
    %216 = arith.subf %212, %215 : vector<16x16xf32>
    %217 = math.exp %216 : vector<16x16xf32>
    %cst_91 = arith.constant dense<0.000000e+00> : vector<16xf32>
    %218 = vector.multi_reduction <add>, %217, %cst_91 [1] : vector<16x16xf32> to vector<16xf32>
    %219 = vector.shape_cast %218 : vector<16xf32> to vector<16x1xf32>
    %220 = arith.truncf %217 : vector<16x16xf32> to vector<16x16xbf16>
    %221 = arith.truncf %206 : vector<16x16xf32> to vector<16x16xbf16>
    %cst_92 = arith.constant dense<0.000000e+00> : vector<16x16xf32>
    %222 = tpu.matmul %220, %221, %cst_92 {dimension_numbers = #tpu.dot_dimension_numbers<[1], [0], [0], [1], [0, 0, 1, 1], [], []>} : vector<16x16xbf16>, vector<16x16xbf16>, vector<16x16xf32> -> vector<16x16xf32>
    %223 = tpu.reciprocal %219 {approx = true} : vector<16x1xf32> -> vector<16x1xf32>
    %224 = vector.broadcast %223 : vector<16x1xf32> to vector<16x16xf32>
    %225 = arith.mulf %222, %224 : vector<16x16xf32>
    %226 = tpu.concatenate %203, %225 in 1 : vector<16x16xf32>, vector<16x16xf32> -> vector<16x32xf32>
    %c1_93 = arith.constant 1 : index
    %c0_94 = arith.constant 0 : index
    %c0_95 = arith.constant 0 : index
    %227 = vector.load %arg6[%c1_93, %c0_94, %c0_95] : memref<2x32x32xbf16, #tpu.memory_space<vmem>>, vector<1x32x32xbf16>
    %228 = vector.shape_cast %227 : vector<1x32x32xbf16> to vector<32x32xbf16>
    %229 = arith.truncf %226 : vector<16x32xf32> to vector<16x32xbf16>
    %cst_96 = arith.constant dense<0.000000e+00> : vector<16x32xf32>
    %230 = tpu.matmul %229, %228, %cst_96 {dimension_numbers = #tpu.dot_dimension_numbers<[1], [0], [0], [1], [0, 0, 1, 1], [], []>} : vector<16x32xbf16>, vector<32x32xbf16>, vector<16x32xf32> -> vector<16x32xf32>
    %231 = arith.addf %146, %230 : vector<16x32xf32>
    %c1_97 = arith.constant 1 : index
    %c0_98 = arith.constant 0 : index
    %c0_99 = arith.constant 0 : index
    %232 = vector.load %arg7[%c1_97, %c0_98, %c0_99] : memref<2x1x32xf32, #tpu.memory_space<vmem>>, vector<1x1x32xf32>
    %233 = vector.shape_cast %232 : vector<1x1x32xf32> to vector<1x32xf32>
    %234 = vector.broadcast %233 : vector<1x32xf32> to vector<16x32xf32>
    %235 = arith.addf %231, %234 : vector<16x32xf32>
    %c1_100 = arith.constant 1 : index
    %c0_101 = arith.constant 0 : index
    %c0_102 = arith.constant 0 : index
    %236 = vector.load %arg8[%c1_100, %c0_101, %c0_102] : memref<2x1x32xf32, #tpu.memory_space<vmem>>, vector<1x1x32xf32>
    %237 = vector.shape_cast %236 : vector<1x1x32xf32> to vector<1x32xf32>
    %c1_103 = arith.constant 1 : index
    %c0_104 = arith.constant 0 : index
    %c0_105 = arith.constant 0 : index
    %238 = vector.load %arg9[%c1_103, %c0_104, %c0_105] : memref<2x1x32xf32, #tpu.memory_space<vmem>>, vector<1x1x32xf32>
    %239 = vector.shape_cast %238 : vector<1x1x32xf32> to vector<1x32xf32>
    %cst_106 = arith.constant dense<0.000000e+00> : vector<16xf32>
    %240 = vector.multi_reduction <add>, %235, %cst_106 [1] : vector<16x32xf32> to vector<16xf32>
    %241 = vector.shape_cast %240 : vector<16xf32> to vector<16x1xf32>
    %cst_107 = arith.constant 3.200000e+01 : f32
    %242 = vector.broadcast %cst_107 : f32 to vector<16x1xf32>
    %243 = arith.divf %241, %242 : vector<16x1xf32>
    %244 = vector.broadcast %243 : vector<16x1xf32> to vector<16x32xf32>
    %245 = arith.subf %235, %244 : vector<16x32xf32>
    %246 = arith.mulf %245, %245 : vector<16x32xf32>
    %cst_108 = arith.constant dense<0.000000e+00> : vector<16xf32>
    %247 = vector.multi_reduction <add>, %246, %cst_108 [1] : vector<16x32xf32> to vector<16xf32>
    %248 = vector.shape_cast %247 : vector<16xf32> to vector<16x1xf32>
    %cst_109 = arith.constant 3.200000e+01 : f32
    %249 = vector.broadcast %cst_109 : f32 to vector<16x1xf32>
    %250 = arith.divf %248, %249 : vector<16x1xf32>
    %251 = vector.broadcast %243 : vector<16x1xf32> to vector<16x32xf32>
    %252 = arith.subf %235, %251 : vector<16x32xf32>
    %cst_110 = arith.constant 9.99999974E-6 : f32
    %253 = vector.broadcast %cst_110 : f32 to vector<16x1xf32>
    %254 = arith.addf %250, %253 : vector<16x1xf32>
    %255 = math.rsqrt %254 : vector<16x1xf32>
    %256 = vector.broadcast %255 : vector<16x1xf32> to vector<16x32xf32>
    %257 = arith.mulf %252, %256 : vector<16x32xf32>
    %258 = vector.broadcast %237 : vector<1x32xf32> to vector<16x32xf32>
    %259 = arith.mulf %257, %258 : vector<16x32xf32>
    %260 = vector.broadcast %239 : vector<1x32xf32> to vector<16x32xf32>
    %261 = arith.addf %259, %260 : vector<16x32xf32>
    %c1_111 = arith.constant 1 : index
    %c0_112 = arith.constant 0 : index
    %c0_113 = arith.constant 0 : index
    %262 = vector.load %arg10[%c1_111, %c0_112, %c0_113] : memref<2x32x128xbf16, #tpu.memory_space<vmem>>, vector<1x32x128xbf16>
    %263 = vector.shape_cast %262 : vector<1x32x128xbf16> to vector<32x128xbf16>
    %264 = arith.truncf %261 : vector<16x32xf32> to vector<16x32xbf16>
    %cst_114 = arith.constant dense<0.000000e+00> : vector<16x128xf32>
    %265 = tpu.matmul %264, %263, %cst_114 {dimension_numbers = #tpu.dot_dimension_numbers<[1], [0], [0], [1], [0, 0, 1, 1], [], []>} : vector<16x32xbf16>, vector<32x128xbf16>, vector<16x128xf32> -> vector<16x128xf32>
    %c1_115 = arith.constant 1 : index
    %c0_116 = arith.constant 0 : index
    %c0_117 = arith.constant 0 : index
    %266 = vector.load %arg11[%c1_115, %c0_116, %c0_117] : memref<2x1x128xf32, #tpu.memory_space<vmem>>, vector<1x1x128xf32>
    %267 = vector.shape_cast %266 : vector<1x1x128xf32> to vector<1x128xf32>
    %268 = vector.broadcast %267 : vector<1x128xf32> to vector<16x128xf32>
    %269 = arith.addf %265, %268 : vector<16x128xf32>
    %cst_118 = arith.constant 5.000000e-01 : f32
    %270 = vector.broadcast %cst_118 : f32 to vector<16x128xf32>
    %271 = arith.mulf %270, %269 : vector<16x128xf32>
    %cst_119 = arith.constant 4.471500e-02 : f32
    %272 = vector.broadcast %cst_119 : f32 to vector<16x128xf32>
    %273 = arith.mulf %272, %269 : vector<16x128xf32>
    %274 = arith.mulf %273, %269 : vector<16x128xf32>
    %275 = arith.mulf %274, %269 : vector<16x128xf32>
    %276 = arith.addf %269, %275 : vector<16x128xf32>
    %cst_120 = arith.constant 0.797884583 : f32
    %277 = vector.broadcast %cst_120 : f32 to vector<16x128xf32>
    %278 = arith.mulf %277, %276 : vector<16x128xf32>
    %279 = math.tanh %278 : vector<16x128xf32>
    %cst_121 = arith.constant 1.000000e+00 : f32
    %280 = vector.broadcast %cst_121 : f32 to vector<16x128xf32>
    %281 = arith.addf %280, %279 : vector<16x128xf32>
    %282 = arith.mulf %271, %281 : vector<16x128xf32>
    %c1_122 = arith.constant 1 : index
    %c0_123 = arith.constant 0 : index
    %c0_124 = arith.constant 0 : index
    %283 = vector.load %arg12[%c1_122, %c0_123, %c0_124] : memref<2x128x32xbf16, #tpu.memory_space<vmem>>, vector<1x128x32xbf16>
    %284 = vector.shape_cast %283 : vector<1x128x32xbf16> to vector<128x32xbf16>
    %285 = arith.truncf %282 : vector<16x128xf32> to vector<16x128xbf16>
    %cst_125 = arith.constant dense<0.000000e+00> : vector<16x32xf32>
    %286 = tpu.matmul %285, %284, %cst_125 {dimension_numbers = #tpu.dot_dimension_numbers<[1], [0], [0], [1], [0, 0, 1, 1], [], []>} : vector<16x128xbf16>, vector<128x32xbf16>, vector<16x32xf32> -> vector<16x32xf32>
    %287 = arith.addf %235, %286 : vector<16x32xf32>
    %c1_126 = arith.constant 1 : index
    %c0_127 = arith.constant 0 : index
    %c0_128 = arith.constant 0 : index
    %288 = vector.load %arg13[%c1_126, %c0_127, %c0_128] : memref<2x1x32xf32, #tpu.memory_space<vmem>>, vector<1x1x32xf32>
    %289 = vector.shape_cast %288 : vector<1x1x32xf32> to vector<1x32xf32>
    %290 = vector.broadcast %289 : vector<1x32xf32> to vector<16x32xf32>
    %291 = arith.addf %287, %290 : vector<16x32xf32>
    %292 = tpu.concatenate %36, %181 in 1 : vector<16x64xf32>, vector<16x64xf32> -> vector<16x128xf32>
    %c0_129 = arith.constant 0 : index
    %c0_130 = arith.constant 0 : index
    %293 = vector.load %arg24[%c0_129, %c0_130] : memref<16x128xf32, #tpu.memory_space<vmem>>, vector<16x128xf32>
    tpu.vector_store %arg24[%c0_129, %c0_130], %292 {strides = array<i32>} : memref<16x128xf32, #tpu.memory_space<vmem>>, vector<16x128xf32>,
    %c0_131 = arith.constant 0 : index
    %c0_132 = arith.constant 0 : index
    %294 = vector.load %arg14[%c0_131, %c0_132] : memref<1x32xf32, #tpu.memory_space<vmem>>, vector<1x32xf32>
    %c0_133 = arith.constant 0 : index
    %c0_134 = arith.constant 0 : index
    %295 = vector.load %arg15[%c0_133, %c0_134] : memref<1x32xf32, #tpu.memory_space<vmem>>, vector<1x32xf32>
    %cst_135 = arith.constant dense<0.000000e+00> : vector<16xf32>
    %296 = vector.multi_reduction <add>, %291, %cst_135 [1] : vector<16x32xf32> to vector<16xf32>
    %297 = vector.shape_cast %296 : vector<16xf32> to vector<16x1xf32>
    %cst_136 = arith.constant 3.200000e+01 : f32
    %298 = vector.broadcast %cst_136 : f32 to vector<16x1xf32>
    %299 = arith.divf %297, %298 : vector<16x1xf32>
    %300 = vector.broadcast %299 : vector<16x1xf32> to vector<16x32xf32>
    %301 = arith.subf %291, %300 : vector<16x32xf32>
    %302 = arith.mulf %301, %301 : vector<16x32xf32>
    %cst_137 = arith.constant dense<0.000000e+00> : vector<16xf32>
    %303 = vector.multi_reduction <add>, %302, %cst_137 [1] : vector<16x32xf32> to vector<16xf32>
    %304 = vector.shape_cast %303 : vector<16xf32> to vector<16x1xf32>
    %cst_138 = arith.constant 3.200000e+01 : f32
    %305 = vector.broadcast %cst_138 : f32 to vector<16x1xf32>
    %306 = arith.divf %304, %305 : vector<16x1xf32>
    %307 = vector.broadcast %299 : vector<16x1xf32> to vector<16x32xf32>
    %308 = arith.subf %291, %307 : vector<16x32xf32>
    %cst_139 = arith.constant 9.99999974E-6 : f32
    %309 = vector.broadcast %cst_139 : f32 to vector<16x1xf32>
    %310 = arith.addf %306, %309 : vector<16x1xf32>
    %311 = math.rsqrt %310 : vector<16x1xf32>
    %312 = vector.broadcast %311 : vector<16x1xf32> to vector<16x32xf32>
    %313 = arith.mulf %308, %312 : vector<16x32xf32>
    %314 = vector.broadcast %294 : vector<1x32xf32> to vector<16x32xf32>
    %315 = arith.mulf %313, %314 : vector<16x32xf32>
    %316 = vector.broadcast %295 : vector<1x32xf32> to vector<16x32xf32>
    %317 = arith.addf %315, %316 : vector<16x32xf32>
    %c0_140 = arith.constant 0 : index
    %c0_141 = arith.constant 0 : index
    %318 = vector.load %arg16[%c0_140, %c0_141] : memref<32x128xbf16, #tpu.memory_space<vmem>>, vector<32x128xbf16>
    %319 = arith.truncf %317 : vector<16x32xf32> to vector<16x32xbf16>
    %cst_142 = arith.constant dense<0.000000e+00> : vector<16x128xf32>
    %320 = tpu.matmul %319, %318, %cst_142 {dimension_numbers = #tpu.dot_dimension_numbers<[1], [0], [0], [1], [0, 0, 1, 1], [], []>} : vector<16x32xbf16>, vector<32x128xbf16>, vector<16x128xf32> -> vector<16x128xf32>
    %c0_143 = arith.constant 0 : index
    %c0_144 = arith.constant 0 : index
    %321 = vector.load %arg25[%c0_143, %c0_144] : memref<16x128xf32, #tpu.memory_space<vmem>>, vector<16x128xf32>
    tpu.vector_store %arg25[%c0_143, %c0_144], %320 {strides = array<i32>} : memref<16x128xf32, #tpu.memory_space<vmem>>, vector<16x128xf32>,
    %c0_145 = arith.constant 0 : index
    %c0_146 = arith.constant 0 : index
    %322 = vector.load %arg17[%c0_145, %c0_146] : memref<1x128xf32, #tpu.memory_space<vmem>>, vector<1x128xf32>
    %323 = vector.broadcast %322 : vector<1x128xf32> to vector<16x128xf32>
    %324 = arith.addf %320, %323 : vector<16x128xf32>
    %cst_147 = arith.constant dense<0xFF800000> : vector<16xf32>
    %325 = vector.multi_reduction <maximumf>, %324, %cst_147 [1] : vector<16x128xf32> to vector<16xf32>
    %326 = vector.shape_cast %325 : vector<16xf32> to vector<16x1xf32>
    %327 = vector.broadcast %326 : vector<16x1xf32> to vector<16x128xf32>
    %328 = arith.subf %324, %327 : vector<16x128xf32>
    %329 = math.exp %328 : vector<16x128xf32>
    %cst_148 = arith.constant dense<0.000000e+00> : vector<16xf32>
    %330 = vector.multi_reduction <add>, %329, %cst_148 [1] : vector<16x128xf32> to vector<16xf32>
    %331 = vector.shape_cast %330 : vector<16xf32> to vector<16x1xf32>
    %332 = math.log %331 : vector<16x1xf32>
    %333 = arith.addf %332, %326 : vector<16x1xf32>
    %c0_149 = arith.constant 0 : index
    %c0_150 = arith.constant 0 : index
    %334 = vector.load %arg18[%c0_149, %c0_150] : memref<16x128xf32, #tpu.memory_space<vmem>>, vector<16x128xf32>
    %cst_151 = arith.constant dense<0.000000e+00> : vector<16xf32>
    %335 = vector.multi_reduction <add>, %334, %cst_151 [1] : vector<16x128xf32> to vector<16xf32>
    %336 = vector.shape_cast %335 : vector<16xf32> to vector<16x1xf32>
    %337 = arith.mulf %334, %320 : vector<16x128xf32>
    %cst_152 = arith.constant dense<0.000000e+00> : vector<16xf32>
    %338 = vector.multi_reduction <add>, %337, %cst_152 [1] : vector<16x128xf32> to vector<16xf32>
    %339 = vector.shape_cast %338 : vector<16xf32> to vector<16x1xf32>
    %340 = arith.subf %333, %339 : vector<16x1xf32>
    %341 = arith.mulf %340, %336 : vector<16x1xf32>
    %cst_153 = arith.constant dense<0.000000e+00> : vector<16xf32>
    %342 = vector.multi_reduction <add>, %341, %cst_153 [1] : vector<16x1xf32> to vector<16xf32>
    %343 = vector.shape_cast %342 : vector<16xf32> to vector<16x1xf32>
    %cst_154 = arith.constant dense<0.000000e+00> : vector<1xf32>
    %344 = vector.multi_reduction <add>, %343, %cst_154 [0] : vector<16x1xf32> to vector<1xf32>
    %345 = vector.shape_cast %344 : vector<1xf32> to vector<1x1xf32>
    %cst_155 = arith.constant dense<0.000000e+00> : vector<16xf32>
    %346 = vector.multi_reduction <add>, %336, %cst_155 [1] : vector<16x1xf32> to vector<16xf32>
    %347 = vector.shape_cast %346 : vector<16xf32> to vector<16x1xf32>
    %cst_156 = arith.constant dense<0.000000e+00> : vector<1xf32>
    %348 = vector.multi_reduction <add>, %347, %cst_156 [0] : vector<16x1xf32> to vector<1xf32>
    %349 = vector.shape_cast %348 : vector<1xf32> to vector<1x1xf32>
    %350 = arith.divf %345, %349 : vector<1x1xf32>
    %c0_157 = arith.constant 0 : index
    %c0_158 = arith.constant 0 : index
    %351 = vector.load %arg27[%c0_157, %c0_158] : memref<1x1xf32, #tpu.memory_space<vmem>>, vector<1x1xf32>
    tpu.vector_store %arg27[%c0_157, %c0_158], %350 {strides = array<i32>} : memref<1x1xf32, #tpu.memory_space<vmem>>, vector<1x1xf32>,
    %c0_159 = arith.constant 0 : index
    %c0_160 = arith.constant 0 : index
    %352 = vector.load %arg19[%c0_159, %c0_160] : memref<2x16xf32, #tpu.memory_space<vmem>>, vector<2x16xf32>
    %353 = arith.truncf %352 : vector<2x16xf32> to vector<2x16xbf16>
    %354 = arith.truncf %317 : vector<16x32xf32> to vector<16x32xbf16>
    %cst_161 = arith.constant dense<0.000000e+00> : vector<2x32xf32>
    %355 = tpu.matmul %353, %354, %cst_161 {dimension_numbers = #tpu.dot_dimension_numbers<[1], [0], [0], [1], [0, 0, 1, 1], [], []>} : vector<2x16xbf16>, vector<16x32xbf16>, vector<2x32xf32> -> vector<2x32xf32>
    %c0_162 = arith.constant 0 : index
    %c0_163 = arith.constant 0 : index
    %356 = vector.load %arg20[%c0_162, %c0_163] : memref<32x128xbf16, #tpu.memory_space<vmem>>, vector<32x128xbf16>
    %357 = arith.truncf %355 : vector<2x32xf32> to vector<2x32xbf16>
    %cst_164 = arith.constant dense<0.000000e+00> : vector<2x128xf32>
    %358 = tpu.matmul %357, %356, %cst_164 {dimension_numbers = #tpu.dot_dimension_numbers<[1], [0], [0], [1], [0, 0, 1, 1], [], []>} : vector<2x32xbf16>, vector<32x128xbf16>, vector<2x128xf32> -> vector<2x128xf32>
    %c0_165 = arith.constant 0 : index
    %c0_166 = arith.constant 0 : index
    %359 = vector.load %arg21[%c0_165, %c0_166] : memref<1x128xf32, #tpu.memory_space<vmem>>, vector<1x128xf32>
    %360 = vector.broadcast %359 : vector<1x128xf32> to vector<2x128xf32>
    %361 = arith.addf %358, %360 : vector<2x128xf32>
    %c0_167 = arith.constant 0 : index
    %c0_168 = arith.constant 0 : index
    %362 = vector.load %arg26[%c0_167, %c0_168] : memref<2x128xf32, #tpu.memory_space<vmem>>, vector<2x128xf32>
    tpu.vector_store %arg26[%c0_167, %c0_168], %361 {strides = array<i32>} : memref<2x128xf32, #tpu.memory_space<vmem>>, vector<2x128xf32>,
    %c0_169 = arith.constant 0 : index
    %c0_170 = arith.constant 0 : index
    %363 = vector.load %arg22[%c0_169, %c0_170] : memref<1x128xf32, #tpu.memory_space<vmem>>, vector<1x128xf32>
    %364 = vector.broadcast %363 : vector<1x128xf32> to vector<2x128xf32>
    %365 = arith.addf %361, %364 : vector<2x128xf32>
    %cst_171 = arith.constant dense<0xFF800000> : vector<2xf32>
    %366 = vector.multi_reduction <maximumf>, %365, %cst_171 [1] : vector<2x128xf32> to vector<2xf32>
    %367 = vector.shape_cast %366 : vector<2xf32> to vector<2x1xf32>
    %368 = vector.broadcast %367 : vector<2x1xf32> to vector<2x128xf32>
    %369 = arith.subf %365, %368 : vector<2x128xf32>
    %370 = math.exp %369 : vector<2x128xf32>
    %cst_172 = arith.constant dense<0.000000e+00> : vector<2xf32>
    %371 = vector.multi_reduction <add>, %370, %cst_172 [1] : vector<2x128xf32> to vector<2xf32>
    %372 = vector.shape_cast %371 : vector<2xf32> to vector<2x1xf32>
    %373 = math.log %372 : vector<2x1xf32>
    %374 = arith.addf %373, %367 : vector<2x1xf32>
    %c0_173 = arith.constant 0 : index
    %c0_174 = arith.constant 0 : index
    %375 = vector.load %arg23[%c0_173, %c0_174] : memref<2x128xf32, #tpu.memory_space<vmem>>, vector<2x128xf32>
    %376 = arith.mulf %375, %361 : vector<2x128xf32>
    %cst_175 = arith.constant dense<0.000000e+00> : vector<2xf32>
    %377 = vector.multi_reduction <add>, %376, %cst_175 [1] : vector<2x128xf32> to vector<2xf32>
    %378 = vector.shape_cast %377 : vector<2xf32> to vector<2x1xf32>
    %379 = arith.subf %374, %378 : vector<2x1xf32>
    %cst_176 = arith.constant dense<0.000000e+00> : vector<2xf32>
    %380 = vector.multi_reduction <add>, %379, %cst_176 [1] : vector<2x1xf32> to vector<2xf32>
    %381 = vector.shape_cast %380 : vector<2xf32> to vector<2x1xf32>
    %cst_177 = arith.constant dense<0.000000e+00> : vector<1xf32>
    %382 = vector.multi_reduction <add>, %381, %cst_177 [0] : vector<2x1xf32> to vector<1xf32>
    %383 = vector.shape_cast %382 : vector<1xf32> to vector<1x1xf32>
    %cst_178 = arith.constant 2.000000e+00 : f32
    %384 = vector.broadcast %cst_178 : f32 to vector<1x1xf32>
    %385 = arith.divf %383, %384 : vector<1x1xf32>
    %c0_179 = arith.constant 0 : index
    %c0_180 = arith.constant 0 : index
    %386 = vector.load %arg28[%c0_179, %c0_180] : memref<1x1xf32, #tpu.memory_space<vmem>>, vector<1x1xf32>
    tpu.vector_store %arg28[%c0_179, %c0_180], %385 {strides = array<i32>} : memref<1x1xf32, #tpu.memory_space<vmem>>, vector<1x1xf32>,
    return
  }
}

</mosaic_0001>

<bundles_post_ra>
// kernel: dialog_forward.1
= control target key start
LH: loop header
LB: loop body
LE: loop exit
PB: predicated region body
PF: predicated region fallthrough
CT: control target
= control target key end

     0   :  { %s3103_s0 = inlined_call_operand.vmem [shape: f32[16,32], index: 0, kind: input, shape index: {}]   ;;  %s3104_s1 = inlined_call_operand.vmem [shape: f32[16,16], index: 1, kind: input, shape index: {}]   ;;  %s3105_s2 = inlined_call_operand.vmem [shape: f32[2,1,32], index: 2, kind: input, shape index: {}]   ;;  %s3106_s3 = inlined_call_operand.vmem [shape: f32[2,1,32], index: 3, kind: input, shape index: {}]   ;;  %s3107_s4 = inlined_call_operand.vmem [shape: bf16[2,32,96], index: 4, kind: input, shape index: {}]   ;;  %s3108_s5 = inlined_call_operand.vmem [shape: f32[2,1,96], index: 5, kind: input, shape index: {}]   ;;  %s3109_s6 = inlined_call_operand.vmem [shape: bf16[2,32,32], index: 6, kind: input, shape index: {}]   ;;  %s3110_s7 = inlined_call_operand.vmem [shape: f32[2,1,32], index: 7, kind: input, shape index: {}]   ;;  %s3111_s8 = inlined_call_operand.vmem [shape: f32[2,1,32], index: 8, kind: input, shape index: {}]   ;;  %s3112_s9 = inlined_call_operand.vmem [shape: f32[2,1,32], index: 9, kind: input, shape index: {}]   ;;  %s3113_s10 = inlined_call_operand.vmem [shape: bf16[2,32,128], index: 10, kind: input, shape index: {}]   ;;  %s3114_s11 = inlined_call_operand.vmem [shape: f32[2,1,128], index: 11, kind: input, shape index: {}]   ;;  %s3115_s12 = inlined_call_operand.vmem [shape: bf16[2,128,32], index: 12, kind: input, shape index: {}]   ;;  %s3116_s13 = inlined_call_operand.vmem [shape: f32[2,1,32], index: 13, kind: input, shape index: {}]   ;;  %s3117_s14 = inlined_call_operand.vmem [shape: f32[1,32], index: 14, kind: input, shape index: {}]   ;;  %s3118_s15 = inlined_call_operand.vmem [shape: f32[1,32], index: 15, kind: input, shape index: {}]   ;;  %s3119_s16 = inlined_call_operand.vmem [shape: bf16[32,128], index: 16, kind: input, shape index: {}]   ;;  %s3120_s17 = inlined_call_operand.vmem [shape: f32[1,128], index: 17, kind: input, shape index: {}]   ;;  %s3121_s18 = inlined_call_operand.vmem [shape: f32[16,128], index: 18, kind: input, shape index: {}]   ;;  %s3122_s19 = inlined_call_operand.vmem [shape: f32[2,16], index: 19, kind: input, shape index: {}]   ;;  %s3123_s20 = inlined_call_operand.vmem [shape: bf16[32,128], index: 20, kind: input, shape index: {}]   ;;  %s3124_s21 = inlined_call_operand.vmem [shape: f32[1,128], index: 21, kind: input, shape index: {}]   ;;  %s3125_s22 = inlined_call_operand.vmem [shape: f32[1,128], index: 22, kind: input, shape index: {}]   ;;  %s3126_s23 = inlined_call_operand.vmem [shape: f32[2,128], index: 23, kind: input, shape index: {}]   ;;  %s3127_s24 = inlined_call_operand.vmem [shape: f32[16,128], index: 24, kind: output, shape index: {0}]   ;;  %s3128_s25 = inlined_call_operand.hbm [shape: f32[16,128], index: 25, kind: output, shape index: {1}]   ;;  %s3129_s26 = inlined_call_operand.hbm [shape: f32[2,128], index: 26, kind: output, shape index: {2}]   ;;  %s3130_s27 = inlined_call_operand.hbm [shape: f32[1,1], index: 27, kind: output, shape index: {3}]   ;;  %s3131_s28 = inlined_call_operand.hbm [shape: f32[1,1], index: 28, kind: output, shape index: {4}]  }
   0x1   :  { %3155 = sst [smem:[#allocation12_spill]] %s3103_s0 }
   0x2   :  { %3156 = sst [smem:[#allocation13_spill]] %s3104_s1 }
   0x3   :  { %3157 = sst [smem:[#allocation14_spill]] %s3105_s2 }
   0x4   :  { %3158 = sst [smem:[#allocation15_spill]] %s3106_s3 }
   0x5   :  { %3159 = sst [smem:[#allocation16_spill]] %s3107_s4 }
   0x6   :  { %3160 = sst [smem:[#allocation17_spill]] %s3108_s5 }
   0x7   :  { %3161 = sst [smem:[#allocation18_spill]] %s3109_s6 }
   0x8   :  { %3162 = sst [smem:[#allocation19_spill]] %s3110_s7 }
   0x9   :  { %3163 = sst [smem:[#allocation20_spill]] %s3111_s8 }
   0xa   :  { %3164 = sst [smem:[#allocation21_spill]] %s3112_s9 }
   0xb   :  { %3165 = sst [smem:[#allocation22_spill]] %s3113_s10 }
   0xc   :  { %3166 = sst [smem:[#allocation23_spill]] %s3114_s11 }
   0xd   :  { %3167 = sst [smem:[#allocation24_spill]] %s3115_s12 }
   0xe   :  { %3168 = sst [smem:[#allocation25_spill]] %s3127_s24 }
   0xf   :  { %3169 = sst [smem:[#allocation26_spill]] %s3130_s27 }
  0x10   :  { %3170 = sst [smem:[#allocation27_spill]] %s3131_s28 }
  0x11   :  { %34 = vsyncpa [#allocation3], 0 }
  0x12   :  { %35 = vsyncpa [#allocation5], 0  ;;  %s3171_s9 = sld [smem:[#allocation12_spill]]  ;;  %vm92_vm0 = vcmask 261120  }
  0x18   :  { %v2606_v0 = vld [vmem:[%s3171_s9] sm:$0xff]  ;;  %v2611_v1 = vld [vmem:[%s3171_s9 + $0x8] sm:$0xff] }
  0x19   :  { %v93_v2 = vsel %vm92_vm0, %v2606_v0, 0.0  ;;  %v96_v3 = vsel %vm92_vm0, %v2611_v1, 0.0 }
  0x1a   :  { %94 = vadd.xlane.f32.xlu0 %v93_v2 }
  0x1e   :  { %97 = vadd.xlane.f32.xlu0 %v96_v3 }
  0x1f   :  { %36 = vsyncpa [#allocation8], 0  ;;  %s3172_s0 = sld [smem:[#allocation16_spill]]  ;;  %v2443_v15 = vmov 0.0   ;;  %vm2444_vm1 = vmmov 0   ;;  %s3173_s12 = sld [smem:[#allocation14_spill]] }
  0x20   :  { %2060 = vmatprep.subr.bf16.mxu0 %v2443_v15  ;;  %2068 = vmatprep.subr.bf16.mxu1 %v2443_v15  ;;  %s3174_s8 = sld [smem:[#allocation15_spill]]  ;;  %s3175_s30 = sld [smem:[#allocation17_spill]]  ;;  %vm208_vm2 = vcmask 130048   ;;  %vm1803_vm3 = vcmask 1041408  }
  0x21   :  { %2064 = vmatprep.mubr.msk.bf16.mxu0 %vm2444_vm1, %v2443_v15  ;;  %2070 = vmatprep.mubr.msk.bf16.mxu1 %vm2444_vm1, %v2443_v15  ;;  %s3148_s3 = smov 80   ;;  %s3150_s6 = smov 96  }
  0x22   :  { %s3147_s10 = smov 112   ;;  %s3176_s2 = sld [smem:[#allocation13_spill]] }
  0x23   :  { %s3149_s4 = smov 64   ;;  %s3146_s5 = smov 48  }
  0x24   :  { %s3177_s29 = sld [smem:[#allocation18_spill]]  ;;  %s3145_s1 = smov 16  }
  0x25   :  { %v2243_v14 = vld [vmem:[%s3172_s0] sm:$0xff]   ;;  %v2244_v16 = vld [vmem:[%s3172_s0 + $0x8] sm:$0xff]   ;;  %s3179_s11 = sld [smem:[#allocation22_spill]]  ;;  %s3182_s7 = sld [smem:[#allocation24_spill]] }
  0x26   :  { %2061 = vmatpush3.bf16.msra.mxu0 %v2243_v14  ;;  %v1894_v25 = vld [vmem:[%s3173_s12] ss:$0 sm:$0xff]  ;;  %s3183_s28 = sld [smem:[#allocation23_spill]]  ;;  %s3188_s24 = smov 48  }
  0x27   :  { %2062 = vmatprep.subr.bf16.mxu0 %v2443_v15  ;;  %v1895_v29 = vld [vmem:[%s3174_s8] ss:$0 sm:$0xff] }
  0x28   :  { %v1896_v34 = vld [vmem:[%s3175_s30] ss:$0 sm:$0xff]  ;;  %v2674_v52 = vld [vmem:[%s3176_s2 + $0x8] sm:$0xff] }
  0x29   :  { %v2669_v48 = vld [vmem:[%s3176_s2] sm:$0xff]  ;;  %s3178_s2 = sld [smem:[#allocation19_spill]] }
  0x2a   :  { %2063 = vmatpush3.bf16.msra.mxu0 %v2244_v16 }
  0x2b   :  { %2074 = vmatprep.subr.bf16.mxu0 %v2443_v15 }
  0xa7   :  { %v95_v4 = vpop.xlane.xlu0 %94 }
  0xa8   :  { %v100_v5 = vmul.f32 0.03125, %v95_v4 }
  0xaa   :  { %v102_v6 = vsub.f32 %v2606_v0, %v100_v5 }
  0xab   :  { %v98_v7 = vpop.xlane.xlu0 %97 }
  0xac   :  { %v101_v8 = vmul.f32 0.03125, %v98_v7  ;;  %v104_v9 = vmul.f32 %v102_v6, %v102_v6 }
  0xae   :  { %v103_v10 = vsub.f32 %v2611_v1, %v101_v8  ;;  %v106_v11 = vsel %vm92_vm0, %v104_v9, 0.0 }
  0xaf   :  { %107 = vadd.xlane.f32.xlu1 %v106_v11 }
  0xb0   :  { %v105_v12 = vmul.f32 %v103_v10, %v103_v10 }
  0xb2   :  { %v109_v13 = vsel %vm92_vm0, %v105_v12, 0.0 }
  0xb3   :  { %110 = vadd.xlane.f32.xlu1 %v109_v13 }
 0x13c   :  { %v108_v17 = vpop.xlane.xlu1 %107 }
 0x13d   :  { %v112_v18 = vmul.f32 0.03125, %v108_v17 }
 0x13f   :  { %v114_v19 = vadd.f32 1e-05, %v112_v18 }
 0x140   :  { %v111_v20 = vpop.xlane.xlu1 %110 }
 0x141   :  { %2275 = vrsqrt.f32 %v114_v19  ;;  %v113_v21 = vmul.f32 0.03125, %v111_v20 }
 0x143   :  { %v115_v22 = vadd.f32 1e-05, %v113_v21 }
 0x145   :  { %2277 = vrsqrt.f32 %v115_v22 }
 0x14b   :  { %v2276_v23 = vpop.eup %2275 }
 0x14c   :  { %v118_v24 = vmul.f32 %v2276_v23, %v102_v6 }
 0x14e   :  { %v126_v28 = vmul.f32 %v1894_v25, %v118_v24 }
 0x14f   :  { %v2278_v26 = vpop.eup %2277 }
 0x150   :  { %v119_v27 = vmul.f32 %v2278_v26, %v103_v10  ;;  %v134_v31 = vadd.f32 %v1895_v29, %v126_v28 }
 0x152   :  { %v127_v30 = vmul.f32 %v1894_v25, %v119_v27 }
 0x154   :  { %v135_v32 = vadd.f32 %v1895_v29, %v127_v30 }
 0x156   :  { %v140_v33 = vpack.c.bf16 %v135_v32, %v134_v31  ;;  %v2245_v32 = vld [vmem:[%s3177_s29] sm:$0xff]  }
 0x158   :  { %2065 = vmatmul.mubr.msk.bf16.vlgmr.msra.gmra.mrb[0].mxu0 %vm92_vm0, %v140_v33 }
 0x159   :  { %2076 = vmatprep.mubr.msk.bf16.mxu0 %vm2444_vm1, %v2443_v15 }
 0x22b   :  { %v197_v35 = vpop.f32.mrb[0].mxu0 }
 0x22c   :  { %v2066_v36 = vpop.f32.mrb[1].mxu0  ;;  %v2647_v38 = vadd.f32 %v1896_v34, %v197_v35 }
 0x22d   :  { %v200_v37 = vpop.f32.mrb[2].mxu0 }
 0x22e   :  { %v2649_v39 = vadd.f32 %v1896_v34, %v200_v37  ;;  %v2067_v40 = vpop.f32.mrb[3].mxu0 }
 0x230   :  { %v204_v41 = vpack.c.bf16 %v2649_v39, %v2647_v38 }
 0x232   :  { %332 = vrot.lane.b32.xlu1 %v204_v41, %s3148_s3  ;;  %206 = vrot.lane.b32.xlu0 %v204_v41, %s3150_s6  ;;  %s3181_s3 = sld [smem:[#allocation21_spill]]  ;;  %s3187_s6 = smov 112  }
 0x236   :  { %330 = vrot.lane.b32.xlu1 %v204_v41, %s3147_s10  ;;  %s3180_s10 = sld [smem:[#allocation20_spill]] }
 0x2a4   :  { %v207_v42 = vpop.permute.xlu0 %206  ;;  %v333_v44 = vpop.permute.xlu1 %332 }
 0x2a5   :  { %v213_v43 = vsel %vm208_vm2, %v207_v42, 0  ;;  %v338_v45 = vsel %vm208_vm2, %v333_v44, 0 }
 0x2a6   :  { %2069 = vmatpush3.bf16.xpose.msra.mxu1 %v213_v43 }
 0x2a7   :  { %2080 = vmatprep.subr.bf16.mxu1 %v2443_v15 }
 0x2a8   :  { %v331_v46 = vpop.permute.xlu1 %330 }
 0x2ad   :  { %2071 = vmatmul.mubr.msk.bf16.vlgmr.msra.gmra.mrb[0].mxu1 %vm208_vm2, %v204_v41 }
 0x2ae   :  { %2081 = vmatpush3.bf16.xpose.msra.mxu1 %v338_v45  ;;  %2082 = vmatprep.mubr.msk.bf16.mxu1 %vm2444_vm1, %v2443_v15 }
 0x2af   :  { %2092 = vmatprep.subr.bf16.mxu1 %v2443_v15 }
 0x2b5   :  { %2083 = vmatmul.mubr.msk.bf16.vlgmr.msra.gmra.mrb[4].mxu1 %vm208_vm2, %v331_v46 }
 0x2b6   :  { %2096 = vmatprep.mubr.msk.bf16.mxu1 %vm2444_vm1, %v2443_v15  ;;  %2093 = vmatpush3.bf16.msra.mxu1 %v2245_v32 }
 0x2b7   :  { %2094 = vmatprep.subr.bf16.mxu1 %v2443_v15 }
 0x380   :  { %v249_v47 = vpop.f32.mrb[0].mxu1 }
 0x381   :  { %v256_v49 = vmul.f32 0.25, %v249_v47  ;;  %v2072_v50 = vpop.f32.mrb[1].mxu1 }
 0x382   :  { %v252_v51 = vpop.f32.mrb[2].mxu1 }
 0x383   :  { %v257_v53 = vmul.f32 0.25, %v252_v51  ;;  %v2073_v54 = vpop.f32.mrb[3].mxu1  ;;  %v258_v55 = vadd.f32 %v256_v49, %v2669_v48 }
 0x385   :  { %v260_v56 = vsel %vm208_vm2, %v258_v55, -inf  ;;  %v259_v57 = vadd.f32 %v257_v53, %v2674_v52 }
 0x386   :  { %261 = vmax.xlane.f32.xlu1 %v260_v56 }
 0x387   :  { %v263_v58 = vsel %vm208_vm2, %v259_v57, -inf }
 0x388   :  { %v374_v59 = vpop.f32.mrb[4].mxu1  ;;  %264 = vmax.xlane.f32.xlu0 %v263_v58 }
 0x389   :  { %v381_v60 = vmul.f32 0.25, %v374_v59  ;;  %v2084_v61 = vpop.f32.mrb[5].mxu1 }
 0x38a   :  { %v377_v62 = vpop.f32.mrb[6].mxu1 }
 0x38b   :  { %v382_v63 = vmul.f32 0.25, %v377_v62  ;;  %v2085_v2 = vpop.f32.mrb[7].mxu1  ;;  %v383_v3 = vadd.f32 %v381_v60, %v2669_v48 }
 0x38d   :  { %v385_v4 = vsel %vm208_vm2, %v383_v3, -inf  ;;  %v384_v5 = vadd.f32 %v382_v63, %v2674_v52 }
 0x38e   :  { %386 = vmax.xlane.f32.xlu0 %v385_v4  ;;  %v1907_v4 = vld [vmem:[%s3178_s2] ss:$0 sm:$0xff] }
 0x38f   :  { %v388_v6 = vsel %vm208_vm2, %v384_v5, -inf }
 0x392   :  { %389 = vmax.xlane.f32.xlu0 %v388_v6 }
 0x397   :  { %279 = vrot.lane.b32.xlu1 %v204_v41, %s3149_s4 }
 0x3a8   :  { %404 = vrot.lane.b32.xlu0 %v204_v41, %s3146_s5  ;;  %v2246_v41 = vld [vmem:[%s3177_s29 + $0x8] sm:$0xff]  }
 0x3a9   :  { %2095 = vmatpush3.bf16.msra.mxu1 %v2246_v41 }
 0x3aa   :  { %2108 = vmatprep.subr.bf16.mxu1 %v2443_v15 }
 0x413   :  { %v262_v7 = vpop.xlane.xlu1 %261 }
 0x414   :  { %v266_v8 = vsub.f32 %v258_v55, %v262_v7 }
 0x415   :  { %v265_v9 = vpop.xlane.xlu0 %264 }
 0x416   :  { %v268_v10 = vmul.f32 1.442695, %v266_v8  ;;  %v267_v11 = vsub.f32 %v259_v57, %v265_v9 }
 0x417   :  { %v280_v12 = vpop.permute.xlu1 %279 }
 0x418   :  { %v270_v13 = vmul.f32 1.442695, %v267_v11  ;;  %2075 = vmatpush3.bf16.msra.mxu0 %v280_v12  ;;  %2279 = vpow2.f32 %v268_v10 }
 0x419   :  { %2086 = vmatprep.subr.bf16.mxu0 %v2443_v15 }
 0x41a   :  { %2281 = vpow2.f32 %v270_v13 }
 0x41b   :  { %v387_v14 = vpop.xlane.xlu0 %386 }
 0x41c   :  { %v391_v16 = vsub.f32 %v383_v3, %v387_v14 }
 0x41e   :  { %v393_v17 = vmul.f32 1.442695, %v391_v16 }
 0x41f   :  { %v390_v18 = vpop.xlane.xlu0 %389 }
 0x420   :  { %2283 = vpow2.f32 %v393_v17  ;;  %v392_v19 = vsub.f32 %v384_v5, %v390_v18 }
 0x422   :  { %v395_v20 = vmul.f32 1.442695, %v392_v19  ;;  %v2280_v21 = vpop.eup %2279 }
 0x423   :  { %v405_v24 = vpop.permute.xlu0 %404  ;;  %v272_v29 = vsel %vm208_vm2, %v2280_v21, 0.0 }
 0x424   :  { %v2282_v22 = vpop.eup %2281  ;;  %2285 = vpow2.f32 %v395_v20 }
 0x425   :  { %v278_v23 = vpack.c.bf16 %v2282_v22, %v2280_v21  ;;  %v275_v31 = vsel %vm208_vm2, %v2282_v22, 0.0 }
 0x427   :  { %2077 = vmatmul.mubr.msk.bf16.vlgmr.msra.gmra.mrb[4].mxu0 %vm208_vm2, %v278_v23  ;;  %v2247_v23 = vld [vmem:[%s3179_s11] sm:$0xff]  }
 0x428   :  { %2087 = vmatpush3.bf16.msra.mxu0 %v405_v24  ;;  %2088 = vmatprep.mubr.msk.bf16.mxu0 %vm2444_vm1, %v2443_v15  ;;  %v2248_v24 = vld [vmem:[%s3179_s11 + $0x8] sm:$0xff]  }
 0x429   :  { %2100 = vmatprep.subr.bf16.mxu0 %v2443_v15 }
 0x42a   :  { %v2284_v25 = vpop.eup %2283 }
 0x42b   :  { %v397_v26 = vsel %vm208_vm2, %v2284_v25, 0.0 }
 0x42c   :  { %398 = vadd.xlane.f32.xlu1 %v397_v26 }
 0x42e   :  { %v2286_v27 = vpop.eup %2285 }
 0x42f   :  { %v400_v28 = vsel %vm208_vm2, %v2286_v27, 0.0  ;;  %v403_v30 = vpack.c.bf16 %v2286_v27, %v2284_v25 }
 0x430   :  { %401 = vadd.xlane.f32.xlu0 %v400_v28  ;;  %273 = vadd.xlane.f32.xlu1 %v272_v29 }
 0x431   :  { %2089 = vmatmul.mubr.msk.bf16.vlgmr.msra.gmra.mrb[8].mxu0 %vm208_vm2, %v403_v30 }
 0x432   :  { %2104 = vmatprep.mubr.msk.bf16.mxu0 %vm2444_vm1, %v2443_v15  ;;  %2101 = vmatpush3.bf16.msra.mxu0 %v2247_v23 }
 0x433   :  { %2102 = vmatprep.subr.bf16.mxu0 %v2443_v15 }
 0x434   :  { %276 = vadd.xlane.f32.xlu0 %v275_v31 }
 0x436   :  { %2103 = vmatpush3.bf16.msra.mxu0 %v2248_v24 }
 0x437   :  { %2128 = vmatprep.subr.bf16.mxu0 %v2443_v15 }
 0x4b9   :  { %v399_v33 = vpop.xlane.xlu1 %398 }
 0x4ba   :  { %2287 = vrcp.f32 %v399_v33  ;;  %v1908_v33 = vld [vmem:[%s3180_s10] ss:$0 sm:$0xff] }
 0x4bd   :  { %v402_v34 = vpop.xlane.xlu0 %401  ;;  %v274_v53 = vpop.xlane.xlu1 %273 }
 0x4be   :  { %2289 = vrcp.f32 %v402_v34 }
 0x4bf   :  { %2291 = vrcp.f32 %v274_v53  ;;  %v2256_v53 = vld [vmem:[%s3182_s7 + $0x38] sm:$0xff]  }
 0x4c1   :  { %v277_v54 = vpop.xlane.xlu0 %276 }
 0x4c2   :  { %2293 = vrcp.f32 %v277_v54  ;;  %v1910_v54 = vld [vmem:[%s3183_s28] ss:$0 sm:$0xff] }
 0x4c4   :  { %v2288_v43 = vpop.eup %2287 }
 0x4c8   :  { %v2290_v45 = vpop.eup %2289 }
 0x4c9   :  { %v2292_v55 = vpop.eup %2291 }
 0x4cc   :  { %v2294_v56 = vpop.eup %2293 }
 0x4fa   :  { %v319_v35 = vpop.f32.mrb[4].mxu0 }
 0x4fb   :  { %v2078_v36 = vpop.f32.mrb[5].mxu0  ;;  %v328_v58 = vmul.f32 %v2292_v55, %v319_v35 }
 0x4fc   :  { %v322_v37 = vpop.f32.mrb[6].mxu0 }
 0x4fd   :  { %v2079_v40 = vpop.f32.mrb[7].mxu0  ;;  %v329_v59 = vmul.f32 %v2294_v56, %v322_v37  ;;  %v1909_v37 = vld [vmem:[%s3181_s3] ss:$0 sm:$0xff] }
 0x504   :  { %v444_v42 = vpop.f32.mrb[8].mxu0 }
 0x505   :  { %v2090_v44 = vpop.f32.mrb[9].mxu0  ;;  %v453_v47 = vmul.f32 %v2288_v43, %v444_v42 }
 0x506   :  { %v447_v46 = vpop.f32.mrb[10].mxu0  ;;  %v2249_v44 = vld [vmem:[%s3182_s7] sm:$0xff]  }
 0x507   :  { %v454_v49 = vmul.f32 %v2290_v45, %v447_v46  ;;  %v2091_v50 = vpop.f32.mrb[11].mxu0  ;;  %v2250_v45 = vld [vmem:[%s3182_s7 + $0x8] sm:$0xff]   ;;  %v2251_v46 = vld [vmem:[%s3182_s7 + $0x10] sm:$0xff]  }
 0x508   :  { %v2254_v50 = vld [vmem:[%s3182_s7 + $0x28] sm:$0xff]  }
 0x509   :  { %v2233_v51 = vpack.i.bf16 %v454_v49, %v453_v47  ;;  %v2252_v47 = vld [vmem:[%s3182_s7 + $0x18] sm:$0xff]   ;;  %v2253_v49 = vld [vmem:[%s3182_s7 + $0x20] sm:$0xff]  }
 0x50b   :  { %2234 = vrot.lane.b32.xlu1 %v2233_v51, %s3145_s1  ;;  %v2255_v51 = vld [vmem:[%s3182_s7 + $0x30] sm:$0xff]   ;;  %s3189_s1 = smov 16  }
 0x57d   :  { %v2235_v57 = vpop.permute.xlu1 %2234 }
 0x57e   :  { %v2237_v60 = vunpack.i.h.bf16 %v2235_v57  ;;  %v2236_v61 = vunpack.i.l.bf16 %v2235_v57 }
 0x580   :  { %v464_v62 = vsel %vm208_vm2, %v329_v59, %v2237_v60  ;;  %v463_v63 = vsel %vm208_vm2, %v328_v58, %v2236_v61 }
 0x581   :  { %v469_v2 = vpack.c.bf16 %v464_v62, %v463_v63 }
 0x583   :  { %2097 = vmatmul.mubr.msk.bf16.vlgmr.msra.gmra.mrb[8].mxu1 %vm92_vm0, %v469_v2 }
 0x584   :  { %2124 = vmatprep.mubr.msk.bf16.mxu1 %vm2444_vm1, %v2443_v15  ;;  %2109 = vmatpush3.bf16.msra.mxu1 %v2249_v44 }
 0x585   :  { %2110 = vmatprep.subr.bf16.mxu1 %v2443_v15 }
 0x588   :  { %2111 = vmatpush3.bf16.msra.mxu1 %v2250_v45 }
 0x589   :  { %2112 = vmatprep.subr.bf16.mxu1 %v2443_v15 }
 0x58c   :  { %2113 = vmatpush3.bf16.msra.mxu1 %v2251_v46 }
 0x58d   :  { %2114 = vmatprep.subr.bf16.mxu1 %v2443_v15 }
 0x590   :  { %2115 = vmatpush3.bf16.msra.mxu1 %v2252_v47 }
 0x591   :  { %2116 = vmatprep.subr.bf16.mxu1 %v2443_v15 }
 0x594   :  { %2117 = vmatpush3.bf16.msra.mxu1 %v2253_v49 }
 0x595   :  { %2118 = vmatprep.subr.bf16.mxu1 %v2443_v15 }
 0x598   :  { %2119 = vmatpush3.bf16.msra.mxu1 %v2254_v50 }
 0x599   :  { %2120 = vmatprep.subr.bf16.mxu1 %v2443_v15 }
 0x59c   :  { %2121 = vmatpush3.bf16.msra.mxu1 %v2255_v51  ;;  %v1925_v51 = vld [vmem:[%s3173_s12 + $0x1] ss:$0 sm:$0xff]  ;;  %s3184_s12 = smov 96  }
 0x59d   :  { %2122 = vmatprep.subr.bf16.mxu1 %v2443_v15 }
 0x5a0   :  { %2123 = vmatpush3.bf16.msra.mxu1 %v2256_v53 }
 0x5a1   :  { %2154 = vmatprep.subr.bf16.mxu1 %v2443_v15 }
 0x656   :  { %v519_v3 = vpop.f32.mrb[8].mxu1 }
 0x657   :  { %v526_v5 = vadd.f32 %v519_v3, %v2606_v0  ;;  %v2098_v6 = vpop.f32.mrb[9].mxu1 }
 0x658   :  { %v522_v7 = vpop.f32.mrb[10].mxu1 }
 0x659   :  { %v2716_v8 = vadd.f32 %v1907_v4, %v526_v5  ;;  %v527_v9 = vadd.f32 %v522_v7, %v2611_v1  ;;  %v2099_v10 = vpop.f32.mrb[11].mxu1 }
 0x65b   :  { %v2719_v11 = vadd.f32 %v1907_v4, %v527_v9  ;;  %v539_v12 = vsel %vm92_vm0, %v2716_v8, 0.0 }
 0x65c   :  { %540 = vadd.xlane.f32.xlu0 %v539_v12 }
 0x65d   :  { %v542_v13 = vsel %vm92_vm0, %v2719_v11, 0.0 }
 0x660   :  { %543 = vadd.xlane.f32.xlu0 %v542_v13 }
 0x6e9   :  { %v541_v14 = vpop.xlane.xlu0 %540 }
 0x6ea   :  { %v545_v16 = vmul.f32 0.03125, %v541_v14 }
 0x6ec   :  { %v547_v0 = vsub.f32 %v2716_v8, %v545_v16 }
 0x6ed   :  { %v544_v17 = vpop.xlane.xlu0 %543 }
 0x6ee   :  { %v546_v18 = vmul.f32 0.03125, %v544_v17  ;;  %v549_v19 = vmul.f32 %v547_v0, %v547_v0 }
 0x6f0   :  { %v548_v1 = vsub.f32 %v2719_v11, %v546_v18  ;;  %v551_v20 = vsel %vm92_vm0, %v549_v19, 0.0 }
 0x6f1   :  { %552 = vadd.xlane.f32.xlu0 %v551_v20  ;;  %v1922_v20 = vld [vmem:[%s3116_s13] ss:$0 sm:$0xff] }
 0x6f2   :  { %v550_v21 = vmul.f32 %v548_v1, %v548_v1 }
 0x6f4   :  { %v554_v22 = vsel %vm92_vm0, %v550_v21, 0.0 }
 0x6f5   :  { %555 = vadd.xlane.f32.xlu0 %v554_v22 }
 0x77e   :  { %v553_v25 = vpop.xlane.xlu0 %552 }
 0x77f   :  { %v557_v26 = vmul.f32 0.03125, %v553_v25 }
 0x781   :  { %v559_v27 = vadd.f32 1e-05, %v557_v26 }
 0x782   :  { %v556_v28 = vpop.xlane.xlu0 %555 }
 0x783   :  { %2295 = vrsqrt.f32 %v559_v27  ;;  %v558_v29 = vmul.f32 0.03125, %v556_v28 }
 0x785   :  { %v560_v30 = vadd.f32 1e-05, %v558_v29 }
 0x787   :  { %2297 = vrsqrt.f32 %v560_v30 }
 0x78d   :  { %v2296_v31 = vpop.eup %2295 }
 0x78e   :  { %v563_v32 = vmul.f32 %v2296_v31, %v547_v0 }
 0x790   :  { %v571_v35 = vmul.f32 %v1908_v33, %v563_v32 }
 0x791   :  { %v2298_v34 = vpop.eup %2297 }
 0x792   :  { %v564_v36 = vmul.f32 %v2298_v34, %v548_v1  ;;  %v579_v41 = vadd.f32 %v1909_v37, %v571_v35 }
 0x794   :  { %v572_v40 = vmul.f32 %v1908_v33, %v564_v36 }
 0x796   :  { %v580_v42 = vadd.f32 %v1909_v37, %v572_v40  ;;  %v2257_v40 = vld [vmem:[%s3172_s0 + $0x10] sm:$0xff]  }
 0x798   :  { %v585_v43 = vpack.c.bf16 %v580_v42, %v579_v41  ;;  %v2258_v41 = vld [vmem:[%s3172_s0 + $0x18] sm:$0xff]  }
 0x79a   :  { %2105 = vmatmul.mubr.msk.bf16.vlgmr.msra.gmra.mrb[12].mxu0 %vm92_vm0, %v585_v43 }
 0x79b   :  { %2132 = vmatprep.mubr.msk.bf16.mxu0 %vm2444_vm1, %v2443_v15  ;;  %2129 = vmatpush3.bf16.msra.mxu0 %v2257_v40 }
 0x79c   :  { %2130 = vmatprep.subr.bf16.mxu0 %v2443_v15 }
 0x79f   :  { %2131 = vmatpush3.bf16.msra.mxu0 %v2258_v41 }
 0x7a0   :  { %2136 = vmatprep.subr.bf16.mxu0 %v2443_v15 }
 0x86d   :  { %v642_v55 = vpop.f32.mrb[12].mxu0 }
 0x86e   :  { %v643_v56 = vadd.f32 %v1910_v54, %v642_v55  ;;  %v2106_v57 = vpop.f32.mrb[13].mxu0 }
 0x86f   :  { %v645_v58 = vpop.f32.mrb[14].mxu0 }
 0x870   :  { %v651_v59 = vmul.f32 0.044715, %v643_v56  ;;  %v646_v60 = vadd.f32 %v1910_v54, %v645_v58  ;;  %v2107_v61 = vpop.f32.mrb[15].mxu0  ;;  %v649_v14 = vmul.f32 0.5, %v643_v56 }
 0x871   :  { %v1932_v61 = vld [vmem:[%s3175_s30 + $0x1] ss:$0 sm:$0xff]  ;;  %s3186_s30 = smov 80  }
 0x872   :  { %v653_v62 = vmul.f32 %v651_v59, %v643_v56  ;;  %v652_v63 = vmul.f32 0.044715, %v646_v60  ;;  %v650_v16 = vmul.f32 0.5, %v646_v60 }
 0x874   :  { %v655_v2 = vmul.f32 %v653_v62, %v643_v56  ;;  %v654_v3 = vmul.f32 %v652_v63, %v646_v60 }
 0x876   :  { %v657_v4 = vadd.f32 %v655_v2, %v643_v56  ;;  %v656_v5 = vmul.f32 %v654_v3, %v646_v60  ;;  %v1926_v56 = vld [vmem:[%s3174_s8 + $0x1] ss:$0 sm:$0xff]  ;;  %s3185_s8 = smov 64  }
 0x878   :  { %v659_v6 = vmul.f32 0.7978846, %v657_v4  ;;  %v658_v7 = vadd.f32 %v656_v5, %v646_v60 }
 0x87a   :  { %2299 = vtanh.f32 %v659_v6  ;;  %v660_v9 = vmul.f32 0.7978846, %v658_v7 }
 0x87c   :  { %2301 = vtanh.f32 %v660_v9 }
 0x884   :  { %v2300_v10 = vpop.eup %2299 }
 0x885   :  { %v663_v12 = vadd.f32 1.0, %v2300_v10 }
 0x886   :  { %v2302_v13 = vpop.eup %2301 }
 0x887   :  { %v664_v0 = vadd.f32 1.0, %v2302_v13  ;;  %v665_v17 = vmul.f32 %v663_v12, %v649_v14 }
 0x889   :  { %v666_v18 = vmul.f32 %v664_v0, %v650_v16 }
 0x88b   :  { %v683_v19 = vpack.c.bf16 %v666_v18, %v665_v17 }
 0x88d   :  { %2125 = vmatmul.mubr.bf16.vlgmr.msra.gmra.mrb[12].mxu1 %v683_v19 }
 0x88e   :  { %2156 = vmatprep.mubr.msk.bf16.mxu1 %vm2444_vm1, %v2443_v15 }
 0x960   :  { %v766_v1 = vpop.f32.mrb[12].mxu1 }
 0x961   :  { %v773_v21 = vadd.f32 %v766_v1, %v2716_v8  ;;  %v2126_v22 = vpop.f32.mrb[13].mxu1 }
 0x962   :  { %v769_v23 = vpop.f32.mrb[14].mxu1 }
 0x963   :  { %v2787_v24 = vadd.f32 %v1922_v20, %v773_v21  ;;  %v774_v25 = vadd.f32 %v769_v23, %v2719_v11  ;;  %v2127_v26 = vpop.f32.mrb[15].mxu1 }
 0x965   :  { %v2790_v27 = vadd.f32 %v1922_v20, %v774_v25  ;;  %v788_v28 = vsel %vm92_vm0, %v2787_v24, 0.0 }
 0x966   :  { %789 = vadd.xlane.f32.xlu1 %v788_v28 }
 0x967   :  { %v791_v29 = vsel %vm92_vm0, %v2790_v27, 0.0 }
 0x968   :  { %792 = vadd.xlane.f32.xlu0 %v791_v29 }
 0x9f3   :  { %v790_v30 = vpop.xlane.xlu1 %789 }
 0x9f4   :  { %v794_v31 = vmul.f32 0.03125, %v790_v30 }
 0x9f5   :  { %v793_v8 = vpop.xlane.xlu0 %792 }
 0x9f6   :  { %v796_v32 = vsub.f32 %v2787_v24, %v794_v31  ;;  %v795_v33 = vmul.f32 0.03125, %v793_v8 }
 0x9f8   :  { %v797_v34 = vsub.f32 %v2790_v27, %v795_v33  ;;  %v798_v11 = vmul.f32 %v796_v32, %v796_v32 }
 0x9fa   :  { %v800_v35 = vsel %vm92_vm0, %v798_v11, 0.0  ;;  %v799_v36 = vmul.f32 %v797_v34, %v797_v34 }
 0x9fb   :  { %801 = vadd.xlane.f32.xlu0 %v800_v35 }
 0x9fc   :  { %v803_v37 = vsel %vm92_vm0, %v799_v36, 0.0 }
 0x9ff   :  { %804 = vadd.xlane.f32.xlu0 %v803_v37 }
 0xa88   :  { %v802_v42 = vpop.xlane.xlu0 %801 }
 0xa89   :  { %v806_v43 = vmul.f32 0.03125, %v802_v42 }
 0xa8b   :  { %v808_v44 = vadd.f32 1e-05, %v806_v43 }
 0xa8c   :  { %v805_v45 = vpop.xlane.xlu0 %804 }
 0xa8d   :  { %2303 = vrsqrt.f32 %v808_v44  ;;  %v807_v46 = vmul.f32 0.03125, %v805_v45 }
 0xa8f   :  { %v809_v47 = vadd.f32 1e-05, %v807_v46 }
 0xa91   :  { %2305 = vrsqrt.f32 %v809_v47 }
 0xa97   :  { %v2304_v49 = vpop.eup %2303 }
 0xa98   :  { %v812_v50 = vmul.f32 %v2304_v49, %v796_v32 }
 0xa9a   :  { %v820_v54 = vmul.f32 %v1925_v51, %v812_v50 }
 0xa9b   :  { %v2306_v53 = vpop.eup %2305 }
 0xa9c   :  { %v813_v55 = vmul.f32 %v2306_v53, %v797_v34  ;;  %v828_v58 = vadd.f32 %v1926_v56, %v820_v54 }
 0xa9e   :  { %v821_v57 = vmul.f32 %v1925_v51, %v813_v55 }
 0xaa0   :  { %v829_v59 = vadd.f32 %v1926_v56, %v821_v57 }
 0xaa2   :  { %v835_v60 = vpack.c.bf16 %v829_v59, %v828_v58 }
 0xaa4   :  { %2133 = vmatmul.mubr.msk.bf16.vlgmr.msra.gmra.mrb[16].mxu0 %vm92_vm0, %v835_v60 }
 0xaa5   :  { %2138 = vmatprep.mubr.msk.bf16.mxu0 %vm2444_vm1, %v2443_v15 }
 0xb77   :  { %v893_v62 = vpop.f32.mrb[16].mxu0 }
 0xb78   :  { %v2134_v63 = vpop.f32.mrb[17].mxu0  ;;  %v2820_v3 = vadd.f32 %v1932_v61, %v893_v62 }
 0xb79   :  { %v896_v2 = vpop.f32.mrb[18].mxu0  ;;  %v2259_v63 = vld [vmem:[%s3177_s29 + $0x10] sm:$0xff]  }
 0xb7a   :  { %v2822_v4 = vadd.f32 %v1932_v61, %v896_v2  ;;  %v2135_v5 = vpop.f32.mrb[19].mxu0 }
 0xb7c   :  { %v900_v6 = vpack.c.bf16 %v2822_v4, %v2820_v3 }
 0xb7e   :  { %902 = vrot.lane.b32.xlu0 %v900_v6, %s3184_s12 }
 0xbf0   :  { %v903_v7 = vpop.permute.xlu0 %902 }
 0xbf1   :  { %v908_v9 = vsel %vm208_vm2, %v903_v7, 0 }
 0xbf2   :  { %2137 = vmatpush3.bf16.xpose.msra.mxu0 %v908_v9 }
 0xbf3   :  { %2142 = vmatprep.subr.bf16.mxu0 %v2443_v15 }
 0xbf9   :  { %2139 = vmatmul.mubr.msk.bf16.vlgmr.msra.gmra.mrb[20].mxu0 %vm208_vm2, %v900_v6 }
 0xbfa   :  { %2144 = vmatprep.mubr.msk.bf16.mxu0 %vm2444_vm1, %v2443_v15 }
 0xccc   :  { %v944_v10 = vpop.f32.mrb[20].mxu0 }
 0xccd   :  { %v951_v12 = vmul.f32 0.25, %v944_v10  ;;  %v2140_v13 = vpop.f32.mrb[21].mxu0 }
 0xcce   :  { %v947_v14 = vpop.f32.mrb[22].mxu0 }
 0xccf   :  { %v952_v16 = vmul.f32 0.25, %v947_v14  ;;  %v2141_v0 = vpop.f32.mrb[23].mxu0  ;;  %v953_v17 = vadd.f32 %v951_v12, %v2669_v48 }
 0xcd1   :  { %v955_v18 = vsel %vm208_vm2, %v953_v17, -inf  ;;  %v954_v19 = vadd.f32 %v952_v16, %v2674_v52 }
 0xcd2   :  { %956 = vmax.xlane.f32.xlu1 %v955_v18 }
 0xcd3   :  { %v958_v1 = vsel %vm208_vm2, %v954_v19, -inf }
 0xcd4   :  { %959 = vmax.xlane.f32.xlu0 %v958_v1 }
 0xce3   :  { %974 = vrot.lane.b32.xlu1 %v900_v6, %s3185_s8 }
 0xce7   :  { %1027 = vrot.lane.b32.xlu1 %v900_v6, %s3186_s30 }
 0xceb   :  { %1025 = vrot.lane.b32.xlu1 %v900_v6, %s3187_s6 }
 0xd5f   :  { %v957_v20 = vpop.xlane.xlu1 %956 }
 0xd60   :  { %v961_v21 = vsub.f32 %v953_v17, %v957_v20 }
 0xd61   :  { %v960_v22 = vpop.xlane.xlu0 %959 }
 0xd62   :  { %v963_v23 = vmul.f32 1.442695, %v961_v21  ;;  %v962_v25 = vsub.f32 %v954_v19, %v960_v22 }
 0xd63   :  { %v975_v26 = vpop.permute.xlu1 %974 }
 0xd64   :  { %v965_v28 = vmul.f32 1.442695, %v962_v25  ;;  %2143 = vmatpush3.bf16.msra.mxu0 %v975_v26  ;;  %2307 = vpow2.f32 %v963_v23 }
 0xd65   :  { %2148 = vmatprep.subr.bf16.mxu0 %v2443_v15 }
 0xd66   :  { %2309 = vpow2.f32 %v965_v28 }
 0xd67   :  { %v1028_v31 = vpop.permute.xlu1 %1027 }
 0xd68   :  { %v1033_v32 = vsel %vm208_vm2, %v1028_v31, 0 }
 0xd6b   :  { %v1026_v33 = vpop.permute.xlu1 %1025 }
 0xd6e   :  { %v2308_v29 = vpop.eup %2307 }
 0xd6f   :  { %v967_v61 = vsel %vm208_vm2, %v2308_v29, 0.0 }
 0xd70   :  { %v2310_v30 = vpop.eup %2309 }
 0xd71   :  { %v973_v8 = vpack.c.bf16 %v2310_v30, %v2308_v29  ;;  %v970_v62 = vsel %vm208_vm2, %v2310_v30, 0.0 }
 0xd73   :  { %2145 = vmatmul.mubr.msk.bf16.vlgmr.msra.gmra.mrb[24].mxu0 %vm208_vm2, %v973_v8  ;;  %v1948_v8 = vld [vmem:[%s3178_s2 + $0x1] ss:$0 sm:$0xff] }
 0xd74   :  { %2149 = vmatpush3.bf16.xpose.msra.mxu0 %v1033_v32  ;;  %2150 = vmatprep.mubr.msk.bf16.mxu0 %vm2444_vm1, %v2443_v15 }
 0xd75   :  { %2160 = vmatprep.subr.bf16.mxu0 %v2443_v15 }
 0xd7b   :  { %2151 = vmatmul.mubr.msk.bf16.vlgmr.msra.gmra.mrb[28].mxu0 %vm208_vm2, %v1026_v33 }
 0xd7c   :  { %2164 = vmatprep.mubr.msk.bf16.mxu0 %vm2444_vm1, %v2443_v15  ;;  %2161 = vmatpush3.bf16.msra.mxu0 %v2259_v63 }
 0xd7d   :  { %2162 = vmatprep.subr.bf16.mxu0 %v2443_v15 }
 0xe46   :  { %v2848_v34 = vpop.f32.mrb[24].mxu0 }
 0xe47   :  { %v2146_v11 = vpop.f32.mrb[25].mxu0 }
 0xe48   :  { %v2850_v35 = vpop.f32.mrb[26].mxu0 }
 0xe49   :  { %v2147_v36 = vpop.f32.mrb[27].mxu0 }
 0xe4e   :  { %v1069_v37 = vpop.f32.mrb[28].mxu0 }
 0xe4f   :  { %v1076_v40 = vmul.f32 0.25, %v1069_v37  ;;  %v2152_v41 = vpop.f32.mrb[29].mxu0 }
 0xe50   :  { %v1072_v42 = vpop.f32.mrb[30].mxu0 }
 0xe51   :  { %v1077_v43 = vmul.f32 0.25, %v1072_v42  ;;  %v2153_v44 = vpop.f32.mrb[31].mxu0  ;;  %v1078_v45 = vadd.f32 %v1076_v40, %v2669_v48 }
 0xe53   :  { %v1080_v46 = vsel %vm208_vm2, %v1078_v45, -inf  ;;  %v1079_v47 = vadd.f32 %v1077_v43, %v2674_v52 }
 0xe54   :  { %1081 = vmax.xlane.f32.xlu1 %v1080_v46 }
 0xe55   :  { %v1083_v49 = vsel %vm208_vm2, %v1079_v47, -inf }
 0xe56   :  { %1084 = vmax.xlane.f32.xlu0 %v1083_v49 }
 0xe6c   :  { %1099 = vrot.lane.b32.xlu0 %v900_v6, %s3188_s24  ;;  %v2260_v6 = vld [vmem:[%s3177_s29 + $0x18] sm:$0xff]  }
 0xe6d   :  { %2163 = vmatpush3.bf16.msra.mxu0 %v2260_v6 }
 0xe6e   :  { %2176 = vmatprep.subr.bf16.mxu0 %v2443_v15 }
 0xee1   :  { %v1082_v50 = vpop.xlane.xlu1 %1081 }
 0xee2   :  { %v1086_v51 = vsub.f32 %v1078_v45, %v1082_v50 }
 0xee3   :  { %v1085_v53 = vpop.xlane.xlu0 %1084 }
 0xee4   :  { %v1088_v54 = vmul.f32 1.442695, %v1086_v51  ;;  %v1087_v55 = vsub.f32 %v1079_v47, %v1085_v53  ;;  %v2261_v51 = vld [vmem:[%s3179_s11 + $0x10] sm:$0xff]   ;;  %v2262_v53 = vld [vmem:[%s3179_s11 + $0x18] sm:$0xff]  }
 0xee6   :  { %2311 = vpow2.f32 %v1088_v54  ;;  %v1090_v56 = vmul.f32 1.442695, %v1087_v55 }
 0xee7   :  { %v1100_v57 = vpop.permute.xlu0 %1099 }
 0xee8   :  { %2313 = vpow2.f32 %v1090_v56  ;;  %2155 = vmatpush3.bf16.msra.mxu1 %v1100_v57 }
 0xee9   :  { %2168 = vmatprep.subr.bf16.mxu1 %v2443_v15 }
 0xef0   :  { %v2312_v48 = vpop.eup %2311 }
 0xef1   :  { %v1092_v52 = vsel %vm208_vm2, %v2312_v48, 0.0 }
 0xef2   :  { %v2314_v58 = vpop.eup %2313  ;;  %1093 = vadd.xlane.f32.xlu0 %v1092_v52 }
 0xef3   :  { %v1095_v59 = vsel %vm208_vm2, %v2314_v58, 0.0  ;;  %v1098_v60 = vpack.c.bf16 %v2314_v58, %v2312_v48 }
 0xef4   :  { %1096 = vadd.xlane.f32.xlu1 %v1095_v59 }
 0xef5   :  { %2157 = vmatmul.mubr.msk.bf16.vlgmr.msra.gmra.mrb[16].mxu1 %vm208_vm2, %v1098_v60  ;;  %v1951_v60 = vld [vmem:[%s3180_s10 + $0x1] ss:$0 sm:$0xff] }
 0xef6   :  { %2172 = vmatprep.mubr.msk.bf16.mxu1 %vm2444_vm1, %v2443_v15  ;;  %2169 = vmatpush3.bf16.msra.mxu1 %v2261_v51 }
 0xef7   :  { %2170 = vmatprep.subr.bf16.mxu1 %v2443_v15 }
 0xef8   :  { %968 = vadd.xlane.f32.xlu1 %v967_v61 }
 0xefa   :  { %2171 = vmatpush3.bf16.msra.mxu1 %v2262_v53 }
 0xefb   :  { %2196 = vmatprep.subr.bf16.mxu1 %v2443_v15 }
 0xefc   :  { %971 = vadd.xlane.f32.xlu1 %v970_v62 }
 0xf7f   :  { %v1094_v2 = vpop.xlane.xlu0 %1093 }
 0xf80   :  { %2315 = vrcp.f32 %v1094_v2  ;;  %v1952_v2 = vld [vmem:[%s3181_s3 + $0x1] ss:$0 sm:$0xff]  ;;  %s2453_s3 = smov [#allocation2]  }
 0xf81   :  { %v1097_v5 = vpop.xlane.xlu1 %1096  ;;  %s1840_s29 = sshll.u32 %s2453_s3, 4  ;;  %s3026_s29 = int_to_ptr.vmem [resolvable:$true] %s1840_s29 }
 0xf82   :  { %2317 = vrcp.f32 %v1097_v5 }
 0xf85   :  { %v969_v18 = vpop.xlane.xlu1 %968 }
 0xf86   :  { %2319 = vrcp.f32 %v969_v18  ;;  %v2270_v18 = vld [vmem:[%s3182_s7 + $0x78] sm:$0xff]  }
 0xf89   :  { %v972_v19 = vpop.xlane.xlu1 %971 }
 0xf8a   :  { %v2316_v9 = vpop.eup %2315  ;;  %2321 = vrcp.f32 %v972_v19  ;;  %v1958_v19 = vld [vmem:[%s3183_s28 + $0x1] ss:$0 sm:$0xff] }
 0xf8c   :  { %v2318_v12 = vpop.eup %2317 }
 0xf90   :  { %v2320_v1 = vpop.eup %2319 }
 0xf91   :  { %v1023_v22 = vmul.f32 %v2320_v1, %v2848_v34 }
 0xf94   :  { %v2322_v20 = vpop.eup %2321 }
 0xf95   :  { %v1024_v23 = vmul.f32 %v2322_v20, %v2850_v35 }
 0xfc8   :  { %v1139_v7 = vpop.f32.mrb[16].mxu1 }
 0xfc9   :  { %v2158_v10 = vpop.f32.mrb[17].mxu1  ;;  %v1148_v14 = vmul.f32 %v2316_v9, %v1139_v7 }
 0xfca   :  { %v1142_v13 = vpop.f32.mrb[18].mxu1  ;;  %v2263_v10 = vld [vmem:[%s3182_s7 + $0x40] sm:$0xff]  }
 0xfcb   :  { %v1149_v16 = vmul.f32 %v2318_v12, %v1142_v13  ;;  %v2159_v0 = vpop.f32.mrb[19].mxu1  ;;  %v2264_v12 = vld [vmem:[%s3182_s7 + $0x48] sm:$0xff]   ;;  %v2265_v13 = vld [vmem:[%s3182_s7 + $0x50] sm:$0xff]  }
 0xfcc   :  { %v2268_v0 = vld [vmem:[%s3182_s7 + $0x68] sm:$0xff]  }
 0xfcd   :  { %v2238_v17 = vpack.i.bf16 %v1149_v16, %v1148_v14  ;;  %v2266_v14 = vld [vmem:[%s3182_s7 + $0x58] sm:$0xff]   ;;  %v2267_v16 = vld [vmem:[%s3182_s7 + $0x60] sm:$0xff]  }
 0xfcf   :  { %2239 = vrot.lane.b32.xlu1 %v2238_v17, %s3189_s1  ;;  %v2269_v17 = vld [vmem:[%s3182_s7 + $0x70] sm:$0xff]  }
0x1041   :  { %v2240_v21 = vpop.permute.xlu1 %2239 }
0x1042   :  { %v2242_v25 = vunpack.i.h.bf16 %v2240_v21  ;;  %v2241_v26 = vunpack.i.l.bf16 %v2240_v21 }
0x1044   :  { %v1159_v28 = vsel %vm208_vm2, %v1024_v23, %v2242_v25  ;;  %v1158_v29 = vsel %vm208_vm2, %v1023_v22, %v2241_v26 }
0x1045   :  { %v1165_v30 = vpack.c.bf16 %v1159_v28, %v1158_v29 }
0x1047   :  { %2165 = vmatmul.mubr.msk.bf16.vlgmr.msra.gmra.mrb[32].mxu0 %vm92_vm0, %v1165_v30 }
0x1048   :  { %2192 = vmatprep.mubr.msk.bf16.mxu0 %vm2444_vm1, %v2443_v15  ;;  %2177 = vmatpush3.bf16.msra.mxu0 %v2263_v10 }
0x1049   :  { %2178 = vmatprep.subr.bf16.mxu0 %v2443_v15 }
0x104c   :  { %2179 = vmatpush3.bf16.msra.mxu0 %v2264_v12 }
0x104d   :  { %2180 = vmatprep.subr.bf16.mxu0 %v2443_v15 }
0x1050   :  { %2181 = vmatpush3.bf16.msra.mxu0 %v2265_v13 }
0x1051   :  { %2182 = vmatprep.subr.bf16.mxu0 %v2443_v15 }
0x1054   :  { %2183 = vmatpush3.bf16.msra.mxu0 %v2266_v14 }
0x1055   :  { %2184 = vmatprep.subr.bf16.mxu0 %v2443_v15 }
0x1058   :  { %2185 = vmatpush3.bf16.msra.mxu0 %v2267_v16 }
0x1059   :  { %2186 = vmatprep.subr.bf16.mxu0 %v2443_v15 }
0x105c   :  { %2187 = vmatpush3.bf16.msra.mxu0 %v2268_v0 }
0x105d   :  { %2188 = vmatprep.subr.bf16.mxu0 %v2443_v15 }
0x1060   :  { %2189 = vmatpush3.bf16.msra.mxu0 %v2269_v17  ;;  %v1988_v17 = vld [vmem:[%s3117_s14] ss:$0 sm:$0xff] }
0x1061   :  { %2190 = vmatprep.subr.bf16.mxu0 %v2443_v15 }
0x1064   :  { %2191 = vmatpush3.bf16.msra.mxu0 %v2270_v18 }
0x111a   :  { %v1215_v31 = vpop.f32.mrb[32].mxu0 }
0x111b   :  { %v1222_v32 = vadd.f32 %v1215_v31, %v2787_v24  ;;  %v2166_v33 = vpop.f32.mrb[33].mxu0 }
0x111c   :  { %v1218_v34 = vpop.f32.mrb[34].mxu0 }
0x111d   :  { %v2885_v11 = vadd.f32 %v1948_v8, %v1222_v32  ;;  %v1223_v35 = vadd.f32 %v1218_v34, %v2790_v27  ;;  %v2167_v36 = vpop.f32.mrb[35].mxu0 }
0x111f   :  { %v2888_v37 = vadd.f32 %v1948_v8, %v1223_v35  ;;  %v1238_v40 = vsel %vm92_vm0, %v2885_v11, 0.0 }
0x1120   :  { %1239 = vadd.xlane.f32.xlu0 %v1238_v40 }
0x1121   :  { %v1241_v41 = vsel %vm92_vm0, %v2888_v37, 0.0 }
0x1124   :  { %1242 = vadd.xlane.f32.xlu0 %v1241_v41 }
0x11ad   :  { %v1240_v42 = vpop.xlane.xlu0 %1239 }
0x11ae   :  { %v1244_v43 = vmul.f32 0.03125, %v1240_v42 }
0x11b0   :  { %v1246_v24 = vsub.f32 %v2885_v11, %v1244_v43 }
0x11b1   :  { %v1243_v44 = vpop.xlane.xlu0 %1242 }
0x11b2   :  { %v1245_v45 = vmul.f32 0.03125, %v1243_v44  ;;  %v1248_v46 = vmul.f32 %v1246_v24, %v1246_v24 }
0x11b4   :  { %v1247_v27 = vsub.f32 %v2888_v37, %v1245_v45  ;;  %v1250_v47 = vsel %vm92_vm0, %v1248_v46, 0.0 }
0x11b5   :  { %1251 = vadd.xlane.f32.xlu1 %v1250_v47  ;;  %v1987_v47 = vld [vmem:[%s3116_s13 + $0x1] ss:$0 sm:$0xff]  ;;  %s2452_s13 = smov [#allocation4]  }
0x11b6   :  { %v1249_v49 = vmul.f32 %v1247_v27, %v1247_v27  ;;  %s1853_s1 = sshll.u32 %s2452_s13, 4  ;;  %s1854_s1 = int_to_ptr.vmem [resolvable:$true] %s1853_s1 }
0x11b7   :  { %s2349_s27 = scalar_lea.vmem %s1854_s1, 32  ;;  %p2354_p1 = scmp.lt.s32.totalorder %s1854_s1, %s1854_s1 }
0x11b8   :  { %v1253_v50 = vsel %vm92_vm0, %v1249_v49, 0.0  ;;  %p2350_p0 = scmp.ne.s32.totalorder %s1854_s1, %s2349_s27  ;;  %p2355_p2 = scmp.lt.s32.totalorder %s2349_s27, %s2349_s27 }
0x11b9   :  { %1254 = vadd.xlane.f32.xlu0 %v1253_v50 }
0x11ba   :  { %p2356_p3 = por %p2355_p2, %p2354_p1 }
0x11bc   :  { %p2357_p4 = pnand %p2356_p3, %p2350_p0 }
0x1242   :  { %v1252_v54 = vpop.xlane.xlu1 %1251 }
0x1243   :  { %v1256_v55 = vmul.f32 0.03125, %v1252_v54 }
0x1245   :  { %v1258_v56 = vadd.f32 1e-05, %v1256_v55 }
0x1246   :  { %v1255_v57 = vpop.xlane.xlu0 %1254 }
0x1247   :  { %2323 = vrsqrt.f32 %v1258_v56  ;;  %v1257_v48 = vmul.f32 0.03125, %v1255_v57 }
0x1249   :  { %v1259_v52 = vadd.f32 1e-05, %v1257_v48 }
0x124b   :  { %2325 = vrsqrt.f32 %v1259_v52 }
0x1251   :  { %v2324_v58 = vpop.eup %2323 }
0x1252   :  { %v1262_v59 = vmul.f32 %v2324_v58, %v1246_v24 }
0x1254   :  { %v1270_v62 = vmul.f32 %v1951_v60, %v1262_v59 }
0x1255   :  { %v2326_v61 = vpop.eup %2325 }
0x1256   :  { %v1263_v63 = vmul.f32 %v2326_v61, %v1247_v27  ;;  %v1278_v6 = vadd.f32 %v1952_v2, %v1270_v62 }
0x1258   :  { %v1271_v5 = vmul.f32 %v1951_v60, %v1263_v63 }
0x125a   :  { %v1279_v7 = vadd.f32 %v1952_v2, %v1271_v5  ;;  %v2271_v5 = vld [vmem:[%s3119_s16] sm:$0xff]  }
0x125c   :  { %v1285_v9 = vpack.c.bf16 %v1279_v7, %v1278_v6  ;;  %v2272_v6 = vld [vmem:[%s3119_s16 + $0x8] sm:$0xff]  }
0x125e   :  { %2173 = vmatmul.mubr.msk.bf16.vlgmr.msra.gmra.mrb[20].mxu1 %vm92_vm0, %v1285_v9 }
0x125f   :  { %2200 = vmatprep.mubr.msk.bf16.mxu1 %vm2444_vm1, %v2443_v15  ;;  %2197 = vmatpush3.bf16.msra.mxu1 %v2271_v5 }
0x1260   :  { %2198 = vmatprep.subr.bf16.mxu1 %v2443_v15 }
0x1263   :  { %2199 = vmatpush3.bf16.msra.mxu1 %v2272_v6 }
0x1264   :  { %2204 = vmatprep.subr.bf16.mxu1 %v2443_v15 }
0x1331   :  { %v1343_v1 = vpop.f32.mrb[20].mxu1 }
0x1332   :  { %v1344_v20 = vadd.f32 %v1958_v19, %v1343_v1  ;;  %v2174_v21 = vpop.f32.mrb[21].mxu1 }
0x1333   :  { %v1346_v22 = vpop.f32.mrb[22].mxu1 }
0x1334   :  { %v1352_v23 = vmul.f32 0.044715, %v1344_v20  ;;  %v1347_v25 = vadd.f32 %v1958_v19, %v1346_v22  ;;  %v2175_v26 = vpop.f32.mrb[23].mxu1  ;;  %v1350_v42 = vmul.f32 0.5, %v1344_v20 }
0x1335   :  { %v1682_v26 = vld [vmem:[%s3122_s19] sm:$0x3] }
0x1336   :  { %v1354_v28 = vmul.f32 %v1352_v23, %v1344_v20  ;;  %v1353_v29 = vmul.f32 0.044715, %v1347_v25  ;;  %v1351_v43 = vmul.f32 0.5, %v1347_v25 }
0x1338   :  { %v1356_v30 = vmul.f32 %v1354_v28, %v1344_v20  ;;  %v1355_v31 = vmul.f32 %v1353_v29, %v1347_v25  ;;  %v1683_v28 = vpack.c.bf16 %v1682_v26, %v1682_v26  ;;  %v2273_v29 = vld [vmem:[%s3123_s20] sm:$0xff]  }
0x133a   :  { %v1358_v8 = vadd.f32 %v1356_v30, %v1344_v20  ;;  %v1357_v32 = vmul.f32 %v1355_v31, %v1347_v25  ;;  %v1989_v20 = vld [vmem:[%s3118_s15] ss:$0 sm:$0xff]  ;;  %v2274_v30 = vld [vmem:[%s3123_s20 + $0x8] sm:$0xff]  }
0x133b   :  { %v1993_v31 = vld [vmem:[%s3120_s17] ss:$0 sm:$0xff] }
0x133c   :  { %v1360_v33 = vmul.f32 0.7978846, %v1358_v8  ;;  %v1359_v34 = vadd.f32 %v1357_v32, %v1347_v25 }
0x133e   :  { %2327 = vtanh.f32 %v1360_v33  ;;  %v1361_v35 = vmul.f32 0.7978846, %v1359_v34 }
0x1340   :  { %2329 = vtanh.f32 %v1361_v35 }
0x1348   :  { %v2328_v36 = vpop.eup %2327 }
0x1349   :  { %v1364_v40 = vadd.f32 1.0, %v2328_v36 }
0x134a   :  { %v2330_v41 = vpop.eup %2329 }
0x134b   :  { %v1365_v24 = vadd.f32 1.0, %v2330_v41  ;;  %v1366_v44 = vmul.f32 %v1364_v40, %v1350_v42 }
0x134d   :  { %v1367_v45 = vmul.f32 %v1365_v24, %v1351_v43 }
0x134f   :  { %v1385_v46 = vpack.c.bf16 %v1367_v45, %v1366_v44 }
0x1351   :  { %2193 = vmatmul.mubr.bf16.vlgmr.msra.gmra.mrb[36].mxu0 %v1385_v46 }
0x1424   :  { %v1468_v27 = vpop.f32.mrb[36].mxu0 }
0x1425   :  { %v1475_v49 = vadd.f32 %v1468_v27, %v2885_v11  ;;  %v2194_v50 = vpop.f32.mrb[37].mxu0 }
0x1426   :  { %v1471_v51 = vpop.f32.mrb[38].mxu0 }
0x1427   :  { %v1476_v53 = vadd.f32 %v1471_v51, %v2888_v37  ;;  %v2195_v54 = vpop.f32.mrb[39].mxu0  ;;  %v1485_v55 = vadd.f32 %v1987_v47, %v1475_v49 }
0x1429   :  { %v1510_v56 = vsel %vm92_vm0, %v1485_v55, 0.0  ;;  %v1486_v57 = vadd.f32 %v1987_v47, %v1476_v53  ;;  %v1644_v47 = vld [vmem:[%s3121_s18] sm:$0xff] }
0x142a   :  { %1511 = vadd.xlane.f32.xlu0 %v1510_v56  ;;  %v1995_v53 = vld [vmem:[%s3124_s21] ss:$0 sm:$0xff]  ;;  %s2451_s21 = smov 32  }
0x142b   :  { %v1513_v48 = vsel %vm92_vm0, %v1486_v57, 0.0  ;;  %v1999_v56 = vld [vmem:[%s3125_s22] ss:$0 sm:$0xff] }
0x142e   :  { %1514 = vadd.xlane.f32.xlu0 %v1513_v48 }
0x14b7   :  { %v1512_v52 = vpop.xlane.xlu0 %1511 }
0x14b8   :  { %v1516_v58 = vmul.f32 0.03125, %v1512_v52 }
0x14ba   :  { %v1518_v59 = vsub.f32 %v1485_v55, %v1516_v58  ;;  %v1816_v55 = vld [vmem:[%s3126_s23] sm:$0x3] }
0x14bb   :  { %v1515_v60 = vpop.xlane.xlu0 %1514 }
0x14bc   :  { %v1517_v61 = vmul.f32 0.03125, %v1515_v60  ;;  %v1520_v62 = vmul.f32 %v1518_v59, %v1518_v59 }
0x14be   :  { %v1519_v11 = vsub.f32 %v1486_v57, %v1517_v61  ;;  %v1522_v63 = vsel %vm92_vm0, %v1520_v62, 0.0 }
0x14bf   :  { %1523 = vadd.xlane.f32.xlu0 %v1522_v63 }
0x14c0   :  { %v1521_v37 = vmul.f32 %v1519_v11, %v1519_v11 }
0x14c2   :  { %v1525_v2 = vsel %vm92_vm0, %v1521_v37, 0.0 }
0x14c3   :  { %1526 = vadd.xlane.f32.xlu0 %v1525_v2 }
0x154c   :  { %v1524_v7 = vpop.xlane.xlu0 %1523 }
0x154d   :  { %v1528_v9 = vmul.f32 0.03125, %v1524_v7  ;;  %v1645_v7 = vld [vmem:[%s3121_s18 + $0x8] sm:$0xff] }
0x154f   :  { %v1530_v10 = vadd.f32 1e-05, %v1528_v9 }
0x1550   :  { %v1527_v12 = vpop.xlane.xlu0 %1526 }
0x1551   :  { %2331 = vrsqrt.f32 %v1530_v10  ;;  %v1529_v13 = vmul.f32 0.03125, %v1527_v12 }
0x1553   :  { %v1531_v14 = vadd.f32 1e-05, %v1529_v13 }
0x1555   :  { %2333 = vrsqrt.f32 %v1531_v14 }
0x155b   :  { %v2332_v16 = vpop.eup %2331 }
0x155c   :  { %v1534_v0 = vmul.f32 %v2332_v16, %v1518_v59 }
0x155e   :  { %v1542_v19 = vmul.f32 %v1988_v17, %v1534_v0 }
0x155f   :  { %v2334_v18 = vpop.eup %2333 }
0x1560   :  { %v1535_v1 = vmul.f32 %v2334_v18, %v1519_v11  ;;  %v1550_v22 = vadd.f32 %v1989_v20, %v1542_v19 }
0x1562   :  { %v1543_v21 = vmul.f32 %v1988_v17, %v1535_v1 }
0x1564   :  { %v1551_v23 = vadd.f32 %v1989_v20, %v1543_v21 }
0x1566   :  { %v1556_v25 = vpack.c.bf16 %v1551_v23, %v1550_v22 }
0x1568   :  { %2201 = vmatmul.mubr.msk.bf16.vlgmr.msra.gmra.mrb[24].mxu1 %vm92_vm0, %v1556_v25 }
0x1569   :  { %2205 = vmatpush3.bf16.msra.mxu1 %v1556_v25  ;;  %2206 = vmatprep.mubr.msk.bf16.mxu1 %vm2444_vm1, %v2443_v15 }
0x156a   :  { %2210 = vmatprep.subr.bf16.mxu1 %v2443_v15 }
0x1570   :  { %2207 = vmatmul.mubr.msk.bf16.vlgmr.msra.gmra.mrb[28].mxu1 %vm208_vm2, %v1683_v28 }
0x1571   :  { %2214 = vmatprep.mubr.msk.bf16.mxu1 %vm2444_vm1, %v2443_v15  ;;  %2211 = vmatpush3.bf16.msra.mxu1 %v2273_v29 }
0x1572   :  { %2212 = vmatprep.subr.bf16.mxu1 %v2443_v15 }
0x1575   :  { %2213 = vmatpush3.bf16.msra.mxu1 %v2274_v30 }
0x163b   :  { %v1606_v8 = vpop.f32.mrb[24].mxu1 }
0x163c   :  { %1613 = vst [vmem:[#allocation2] sm:$0xff] %v1606_v8  ;;  %v2202_v32 = vpop.f32.mrb[25].mxu1  ;;  %v1622_v33 = vadd.f32 %v1993_v31, %v1606_v8  ;;  %v1650_v49 = vmul.f32 %v1644_v47, %v1606_v8 }
0x163d   :  { %v1609_v34 = vpop.f32.mrb[26].mxu1 }
0x163e   :  { %1614 = vst [vmem:[#allocation2 + $0x8] sm:$0xff] %v1609_v34  ;;  %1624 = vmax.xlane.f32.xlu0 %v1622_v33  ;;  %v2203_v35 = vpop.f32.mrb[27].mxu1  ;;  %v1623_v36 = vadd.f32 %v1993_v31, %v1609_v34  ;;  %v1651_v9 = vmul.f32 %v1645_v7, %v1609_v34 }
0x1642   :  { %1626 = vmax.xlane.f32.xlu0 %v1623_v36 }
0x1643   :  { %v1721_v15 = vpop.f32.mrb[28].mxu1 }
0x1644   :  { %v1731_v40 = vpack.c.bf16 %v1721_v15, %v1721_v15  ;;  %v2208_v41 = vpop.f32.mrb[29].mxu1 }
0x1645   :  { %v1724_v42 = vpop.f32.mrb[30].mxu1 }
0x1646   :  { %v2209_v43 = vpop.f32.mrb[31].mxu1  ;;  %2215 = vmatmul.mubr.msk.bf16.vlgmr.msra.gmra.mrb[32].mxu1 %vm92_vm0, %v1731_v40 }
0x16cb   :  { %v2993_v24 = vpop.xlane.xlu0 %1624 }
0x16cc   :  { %v1628_v50 = vsub.f32 %v1622_v33, %v2993_v24 }
0x16ce   :  { %v1630_v51 = vmul.f32 1.442695, %v1628_v50 }
0x16cf   :  { %v2995_v44 = vpop.xlane.xlu0 %1626 }
0x16d0   :  { %v1629_v45 = vsub.f32 %v1623_v36, %v2995_v44 }
0x16d2   :  { %v1632_v46 = vmul.f32 1.442695, %v1629_v45 }
0x16d4   :  { %2335 = vpow2.f32 %v1632_v46 }
0x16d5   :  { %2337 = vpow2.f32 %v1630_v51 }
0x16de   :  { %v2336_v27 = vpop.eup %2335 }
0x16df   :  { %1636 = vadd.xlane.f32.xlu1 %v2336_v27  ;;  %v2338_v11 = vpop.eup %2337 }
0x16e3   :  { %1646 = vadd.xlane.f32.xlu1 %v1644_v47 }
0x16e7   :  { %1652 = vadd.xlane.f32.xlu1 %v1650_v49 }
0x1719   :  { %v1788_v54 = vpop.f32.mrb[32].mxu1 }
0x171a   :  { %v1789_v57 = vadd.f32 %v1995_v53, %v1788_v54  ;;  %v2216_v48 = vpop.f32.mrb[33].mxu1 }
0x171b   :  { %v1791_v52 = vpop.f32.mrb[34].mxu1 }
0x171c   :  { %1794 = vst [vmem:[#allocation4] sm:$0x3] %v1789_v57  ;;  %v2217_v58 = vpop.f32.mrb[35].mxu1  ;;  %v1817_v59 = vmul.f32 %v1816_v55, %v1789_v57  ;;  %v1802_v60 = vadd.f32 %v1999_v56, %v1789_v57 }
0x171e   :  { %v1818_v61 = vsel %vm1803_vm3, %v1817_v59, 0.0  ;;  %v1804_v62 = vsel %vm1803_vm3, %v1802_v60, -inf }
0x171f   :  { %1819 = vadd.xlane.f32.xlu1 %v1818_v61  ;;  %1805 = vmax.xlane.f32.xlu0 %v1804_v62 }
0x1723   :  { %1634 = vadd.xlane.f32.xlu0 %v2338_v11 }
0x1730   :  { %1491 = vrot.lane.b32.xlu1 %v2649_v39, %s3184_s12 }
0x1734   :  { %1497 = vrot.lane.b32.xlu1 %v2820_v3, %s2451_s21 }
0x17ac   :  { %v3016_v63 = vpop.xlane.xlu0 %1805 }
0x17ad   :  { %v1807_v37 = vsub.f32 %v1802_v60, %v3016_v63 }
0x17af   :  { %v1808_v2 = vmul.f32 1.442695, %v1807_v37 }
0x17b1   :  { %2339 = vpow2.f32 %v1808_v2 }
0x17bb   :  { %v2340_v5 = vpop.eup %2339 }
0x17bc   :  { %v1810_v6 = vsel %vm1803_vm3, %v2340_v5, 0.0 }
0x17bd   :  { %1811 = vadd.xlane.f32.xlu0 %v1810_v6 }
0x17c1   :  { %1648 = vadd.xlane.f32.xlu0 %v1645_v7 }
0x17c5   :  { %1654 = vadd.xlane.f32.xlu0 %v1651_v9 }
0x17db   :  { %1489 = vrot.lane.b32.xlu0 %v2647_v38, %s3184_s12 }
0x17df   :  { %1499 = vrot.lane.b32.xlu0 %v2822_v4, %s2451_s21 }
0x17e0   :  { %2360 = shalt.err (!%p2357_p4)
}
0x17e1   :  { %s2361_s12 = scalar_lea.hbm %s3129_s26, 32 }
0x17e2   :  { %p2362_p5 = scmp.ne.s32.totalorder %s3129_s26, %s2361_s12  ;;  %p2365_p6 = scmp.lt.u32.totalorder %s2361_s12, %s3129_s26 }
0x17e4   :  { %p2367_p7 = pnand %p2365_p6, %p2362_p5 }
0x17e6   :  { %2370 = shalt.err (!%p2367_p7)
}
0x17e7   :  { %1856 = dma.vmem_to_hbm [thread:$0]  %s1854_s1, 32, %s3129_s26, [#allocation5]  }
0x17e8   :  { %s2371_s24 = scalar_lea.vmem %s3026_s29, 256  ;;  %p2376_p9 = scmp.lt.s32.totalorder %s3026_s29, %s3026_s29 }
0x17e9   :  { %p2372_p8 = scmp.ne.s32.totalorder %s3026_s29, %s2371_s24  ;;  %p2377_p10 = scmp.lt.s32.totalorder %s2371_s24, %s2371_s24 }
0x17eb   :  { %p2378_p11 = por %p2377_p10, %p2376_p9 }
0x17ed   :  { %p2379_p12 = pnand %p2378_p11, %p2372_p8 }
0x17ef   :  { %2382 = shalt.err (!%p2379_p12)
}
0x17f0   :  { %s2383_s11 = scalar_lea.hbm %s3128_s25, 256 }
0x17f1   :  { %p2384_p13 = scmp.ne.s32.totalorder %s3128_s25, %s2383_s11  ;;  %p2387_p0 = scmp.lt.u32.totalorder %s2383_s11, %s3128_s25 }
0x17f3   :  { %p2389_p1 = pnand %p2387_p0, %p2384_p13 }
0x17f5   :  { %2392 = shalt.err (!%p2389_p1)
}
0x17f6   :  { %s2454_s26 = smov 128   ;;  %s2455_s5 = smov 8   ;;  %v1635_v38 = vpop.xlane.xlu0 %1634  ;;  %v1637_v39 = vpop.xlane.xlu1 %1636  ;;  %vm1503_vm4 = vcmask 523264   ;;  %vm1680_vm5 = vcmask 0  }
0x17f7   :  { %1846 = dma.vmem_to_hbm [thread:$0]  %s3026_s29, 256, %s3128_s25, [#allocation3], %s2454_s26, %s2454_s26, %s2455_s5   ;;  %2341 = vlog2.f32 %v1635_v38 }
0x17f8   :  { %2343 = vlog2.f32 %v1637_v39  ;;  %s3190_s21 = sld [smem:[#allocation25_spill]]  ;;  %s2456_s13 = smov [#allocation6]  }
0x17f9   :  { %s1863_s1 = sshll.u32 %s2456_s13, 4  ;;  %s2457_s3 = smov [#allocation7]   ;;  %s1864_s1 = int_to_ptr.vmem [resolvable:$true] %s1863_s1 }
0x17fa   :  { %v1647_v3 = vpop.xlane.xlu1 %1646  ;;  %s1873_s29 = sshll.u32 %s2457_s3, 4  ;;  %s2393_s27 = scalar_lea.vmem %s1864_s1, 16  ;;  %s3069_s29 = int_to_ptr.vmem [resolvable:$true] %s1873_s29 }
0x17fb   :  { %p2394_p2 = scmp.ne.s32.totalorder %s1864_s1, %s2393_s27  ;;  %s2397_s18 = scalar_lea.vmem %s1864_s1, 32 }
0x17fc   :  { %p2398_p3 = scmp.lt.s32.totalorder %s1864_s1, %s1864_s1  ;;  %p2399_p4 = scmp.lt.s32.totalorder %s2397_s18, %s2393_s27 }
0x17fe   :  { %v1653_v10 = vpop.xlane.xlu1 %1652  ;;  %p2400_p5 = por %p2399_p4, %p2398_p3 }
0x1800   :  { %p2401_p6 = pnand %p2400_p5, %p2394_p2 }
0x1801   :  { %v2342_v4 = vpop.eup %2341 }
0x1802   :  { %v1639_v12 = vmul.f32 0.6931472, %v2342_v4  ;;  %v2344_v13 = vpop.eup %2343  ;;  %v1820_v14 = vpop.xlane.xlu1 %1819 }
0x1803   :  { %v1641_v0 = vmul.f32 0.6931472, %v2344_v13 }
0x1804   :  { %v1642_v17 = vadd.f32 %v1639_v12, %v2993_v24 }
0x1805   :  { %v1643_v22 = vadd.f32 %v1641_v0, %v2995_v44 }
0x1806   :  { %v1492_v1 = vpop.permute.xlu1 %1491  ;;  %v1656_v20 = vsub.f32 %v1642_v17, %v1653_v10 }
0x1808   :  { %v1658_v30 = vmul.f32 %v1656_v20, %v1647_v3 }
0x180a   :  { %v1498_v8 = vpop.permute.xlu1 %1497 }
0x184a   :  { %v1812_v16 = vpop.xlane.xlu0 %1811 }
0x184b   :  { %2345 = vlog2.f32 %v1812_v16 }
0x184e   :  { %v1649_v18 = vpop.xlane.xlu0 %1648 }
0x184f   :  { %v1671_v19 = vadd.f32 %v1649_v18, %v1647_v3 }
0x1851   :  { %v1672_v21 = vrot.slane %v1671_v19, 4 }
0x1852   :  { %v1655_v23 = vpop.xlane.xlu0 %1654 }
0x1853   :  { %v1673_v25 = vadd.f32 %v1672_v21, %v1671_v19  ;;  %v1657_v26 = vsub.f32 %v1643_v22, %v1655_v23 }
0x1855   :  { %v2346_v28 = vpop.eup %2345  ;;  %v1674_v29 = vrot.slane %v1673_v25, 2  ;;  %v1659_v31 = vmul.f32 %v1657_v26, %v1649_v18 }
0x1856   :  { %v1814_v32 = vmul.f32 0.6931472, %v2346_v28  ;;  %v1490_v33 = vpop.permute.xlu0 %1489 }
0x1857   :  { %v1675_v34 = vadd.f32 %v1674_v29, %v1673_v25  ;;  %v1662_v35 = vadd.f32 %v1659_v31, %v1658_v30  ;;  %v1504_v36 = vsel %vm1503_vm4, %v1490_v33, %v1498_v8 }
0x1858   :  { %v1815_v15 = vadd.f32 %v1814_v32, %v3016_v63  ;;  %1506 = vst [vmem:[%s3190_s21] sm:$0xff] %v1504_v36 }
0x1859   :  { %v1676_v40 = vrot.slane %v1675_v34, 1  ;;  %v1663_v41 = vrot.slane %v1662_v35, 4 }
0x185a   :  { %v1821_v42 = vsub.f32 %v1815_v15, %v1820_v14  ;;  %v1500_v43 = vpop.permute.xlu0 %1499 }
0x185b   :  { %v1677_v24 = vadd.f32 %v1676_v40, %v1675_v34  ;;  %v1664_v44 = vadd.f32 %v1663_v41, %v1662_v35  ;;  %v1505_v45 = vsel %vm1503_vm4, %v1492_v1, %v1500_v43 }
0x185c   :  { %1507 = vst [vmem:[%s3190_s21 + $0x8] sm:$0xff] %v1505_v45  ;;  %v1823_v46 = vsel %vm1803_vm3, %v1821_v42, 0.0 }
0x185d   :  { %2347 = vrcp.f32 %v1677_v24  ;;  %v1665_v27 = vrot.slane %v1664_v44, 2  ;;  %v1824_v47 = vrot.slane %v1823_v46, 4 }
0x185f   :  { %v1666_v49 = vadd.f32 %v1665_v27, %v1664_v44  ;;  %v1825_v50 = vadd.f32 %v1824_v47, %v1823_v46 }
0x1861   :  { %v1826_v51 = vrot.slane %v1825_v50, 2  ;;  %v1667_v53 = vrot.slane %v1666_v49, 1 }
0x1863   :  { %v1827_v54 = vadd.f32 %v1826_v51, %v1825_v50  ;;  %v1668_v56 = vadd.f32 %v1667_v53, %v1666_v49 }
0x1865   :  { %v1828_v55 = vrot.slane %v1827_v54, 1 }
0x1867   :  { %v2348_v57 = vpop.eup %2347  ;;  %v1829_v48 = vadd.f32 %v1828_v55, %v1827_v54 }
0x1868   :  { %v1679_v52 = vmul.f32 %v2348_v57, %v1668_v56 }
0x1869   :  { %v1831_v58 = vmul.f32 0.5, %v1829_v48 }
0x186a   :  { %1681 = vst.msk [vmem:[#allocation6] sm:$0x1] %vm1680_vm5, %v1679_v52 }
0x186b   :  { %2404 = shalt.err (!%p2401_p6)
}
0x186c   :  { %s3191_s16 = sld [smem:[#allocation26_spill]] }
0x1872   :  { %s2405_s8 = scalar_lea.hbm %s3191_s16, 16 }
0x1873   :  { %p2406_p7 = scmp.ne.s32.totalorder %s3191_s16, %s2405_s8  ;;  %p2409_p8 = scmp.lt.u32.totalorder %s2405_s8, %s3191_s16 }
0x1875   :  { %p2411_p9 = pnand %p2409_p8, %p2406_p7 }
0x1877   :  { %2414 = shalt.err (!%p2411_p9)
}
0x1878   :  { %1866 = dma.vmem_to_hbm [thread:$0]  %s1864_s1, 16, %s3191_s16, [#allocation5]   ;;  %1832 = vst.msk [vmem:[#allocation7] sm:$0x1] %vm1680_vm5, %v1831_v58 }
0x1879   :  { %s2415_s19 = scalar_lea.vmem %s3069_s29, 16  ;;  %s2419_s11 = scalar_lea.vmem %s3069_s29, 32 }
0x187a   :  { %p2416_p10 = scmp.ne.s32.totalorder %s3069_s29, %s2415_s19  ;;  %p2420_p11 = scmp.lt.s32.totalorder %s3069_s29, %s3069_s29 }
0x187b   :  { %p2421_p12 = scmp.lt.s32.totalorder %s2419_s11, %s2415_s19 }
0x187d   :  { %p2422_p13 = por %p2421_p12, %p2420_p11 }
0x187f   :  { %p2423_p0 = pnand %p2422_p13, %p2416_p10 }
0x1881   :  { %2426 = shalt.err (!%p2423_p0)
}
0x1882   :  { %s3192_s9 = sld [smem:[#allocation27_spill]] }
0x1888   :  { %s2427_s0 = scalar_lea.hbm %s3192_s9, 16 }
0x1889   :  { %p2428_p1 = scmp.ne.s32.totalorder %s3192_s9, %s2427_s0  ;;  %p2431_p2 = scmp.lt.u32.totalorder %s2427_s0, %s3192_s9 }
0x188b   :  { %p2433_p3 = pnand %p2431_p2, %p2428_p1 }
0x188d   :  { %2436 = shalt.err (!%p2433_p3)
}
0x188e   :  { %1876 = dma.vmem_to_hbm [thread:$0]  %s3069_s29, 16, %s3192_s9, [#allocation8]  }
0x188f   :  { %2437 = dma.done.wait [#allocation3], 256  }
0x1890   :  { %2438 = vsyncadd [#allocation3], 4294967040 }
0x1891   :  { %2439 = dma.done.wait [#allocation5], 48  }
0x1892   :  { %2440 = vsyncadd [#allocation5], 4294967248 }
0x1893   :  { %2441 = dma.done.wait [#allocation8], 16  }
0x1894   :  { %2442 = vsyncadd [#allocation8], 4294967280 }
0x1895   :  { %1891 = vsyncpa [#allocation3], 1 }
0x1896   :  { %1892 = vsyncpa [#allocation5], 1 }
0x1897   :  { %1893 = vsyncpa [#allocation8], 1 }

</bundles_post_ra>
